<compile_context>
chip_gen: v5e
topology: v5e:2x2
jax: 0.10.0
libtpu: 0.0.40
codegen_flags: <defaults>
</compile_context>

<pallas_src>
import jax
import jax.numpy as jnp
from jax.experimental import pallas as pl
from jax.experimental.pallas import tpu as pltpu


# ------------------------------- helpers ----------------------------------- #

def _round_up(x, m):
    return (x + m - 1) // m * m


def _gelu_tanh(x):
    # tanh-form GELU: tanh routes to the EUP slot (frees the VALU slot) and is
    # within ~1e-3 of torch's erf GELU — far below the bf16-matmul noise here.
    c = 0.7978845608028654  # sqrt(2/pi)
    return 0.5 * x * (1.0 + jnp.tanh(c * (x + 0.044715 * (x * x * x))))


def _default_full_prefold():
    """Full pre-GELU fold pays off on 256-wide MXUs (v6e/v7x); on 128-wide MXUs
    (<= v5) it would double the K=1000 matmul's passes, so keep the narrow form."""
    try:
        kind = jax.devices()[0].device_kind.lower()
    except Exception:
        return True
    return not any(t in kind for t in ("v2", "v3", "v4", "v5"))


# ----------------------------- kernel bodies ------------------------------- #

def _kernel_prefold(seq_ref, cmap_ref,
                    wcm_ref, wsq_ref, w1a_ref, bh1_ref,
                    w2b_ref, b2b_ref, w2_ref, b2_ref,
                    out_ref):
    """v6e/v7x variant: full pre-GELU fold into the K=Kc matmul."""
    f32 = jnp.float32
    cdt = wcm_ref.dtype                       # bf16 MXU input dtype
    seq = seq_ref[...].astype(cdt)            # inputs stream in stored dtype;
    cmap = cmap_ref[...].astype(cdt)          # cast in-kernel (no host pass)

    # h1 = cat[v_c, v_s] @ W1 + b1 fully folded:
    #   h1 = cmap @ (Wcs*Wvc*W1a) + seq @ (Wvs*W1b) + b_h1
    h1 = (jnp.dot(cmap, wcm_ref[...], preferred_element_type=f32)
          + jnp.dot(seq, wsq_ref[...], preferred_element_type=f32)
          + bh1_ref[...])
    g1 = _gelu_tanh(h1)

    # s_c = g1 @ W2 + b2 is only consumed by the second Mlp, so
    #   h2 = seq @ W1a + g1 @ (W2*W1b) + (b2*W1b + b1)
    h2 = (jnp.dot(seq, w1a_ref[...], preferred_element_type=f32)
          + jnp.dot(g1.astype(cdt), w2b_ref[...], preferred_element_type=f32)
          + b2b_ref[...])
    g2 = _gelu_tanh(h2)

    out = jnp.dot(g2.astype(cdt), w2_ref[...], preferred_element_type=f32) + b2_ref[...]
    out_ref[...] = out.astype(out_ref.dtype)


def _kernel_narrow(seq_ref, cmap_ref,
                   wcsv_ref, bcv_ref, wvs_ref, bvs_ref,
                   w1_ref, b1_ref, w1a_ref,
                   w2b_ref, b2b_ref, w2_ref, b2_ref,
                   out_ref, vcat_ref):
    """v5e variant: narrow chain (Wcs*Wvc fold only) + K=2C merged fc1 dot."""
    f32 = jnp.float32
    cdt = wcsv_ref.dtype
    seq = seq_ref[...].astype(cdt)
    cmap = cmap_ref[...].astype(cdt)
    C = seq_ref.shape[1]

    v_c = jnp.dot(cmap, wcsv_ref[...], preferred_element_type=f32) + bcv_ref[...]
    v_s = jnp.dot(seq, wvs_ref[...], preferred_element_type=f32) + bvs_ref[...]

    # Merge the two K=C h1 dots into one K=2C dot via a (tm, 2C) VMEM scratch.
    vcat_ref[:, :C] = v_c
    vcat_ref[:, C:] = v_s
    h1 = jnp.dot(vcat_ref[...].astype(cdt), w1_ref[...],
                 preferred_element_type=f32) + b1_ref[...]
    g1 = _gelu_tanh(h1)

    h2 = (jnp.dot(seq, w1a_ref[...], preferred_element_type=f32)
          + jnp.dot(g1.astype(cdt), w2b_ref[...], preferred_element_type=f32)
          + b2b_ref[...])
    g2 = _gelu_tanh(h2)

    out = jnp.dot(g2.astype(cdt), w2_ref[...], preferred_element_type=f32) + b2_ref[...]
    out_ref[...] = out.astype(out_ref.dtype)


# --------------------- one-time parameter preprocessing -------------------- #

def prepare_params(params, *, compute_dtype=jnp.bfloat16, full_prefold=None):
    """Hoisted weight prep: v-slices, all algebraic folds (in f32), bf16 casts.

    full_prefold=True  -> v6e/v7x variant (pre-GELU chain folded into K=Kc matmul)
    full_prefold=False -> v5e variant (narrow chain + K=2C merged fc1)
    """
    if full_prefold is None:
        full_prefold = _default_full_prefold()
    f32 = jnp.float32
    cdt = compute_dtype

    wcs = params["wcs"].astype(f32)
    bcs = params["bcs"].astype(f32)
    Kc, C = wcs.shape
    wvc = params["w_qkv_c"][:, 2 * C:3 * C].astype(f32)
    bvc = params["b_qkv_c"][2 * C:3 * C].astype(f32)
    wvs = params["w_qkv_s"][:, 2 * C:3 * C].astype(f32)
    bvs = params["b_qkv_s"][2 * C:3 * C].astype(f32)
    w1 = params["w1"].astype(f32)
    b1 = params["b1"].astype(f32)
    w2 = params["w2"].astype(f32)
    b2 = params["b2"].astype(f32)
    Hd = w1.shape[1]
    w1a, w1b = w1[:C], w1[C:]

    # Shared fold:  h2 = seq@W1a + g1@(W2*W1b) + (b2*W1b + b1)
    w2b = w2 @ w1b
    b2b = b2 @ w1b + b1

    if full_prefold:
        wcm = wcs @ (wvc @ w1a)                       # (Kc, Hd)  fold, f32
        wsq = wvs @ w1b                               # (C, Hd)
        bh1 = (bcs @ wvc + bvc) @ w1a + bvs @ w1b + b1
        weights = [wcm.astype(cdt), wsq.astype(cdt), w1a.astype(cdt),
                   bh1.reshape(1, Hd),
                   w2b.astype(cdt), b2b.reshape(1, Hd),
                   w2.astype(cdt), b2.reshape(1, C)]
    else:
        wcsv = wcs @ wvc                              # (Kc, C)  fold, f32
        bcv = bcs @ wvc + bvc
        weights = [wcsv.astype(cdt), bcv.reshape(1, C),
                   wvs.astype(cdt), bvs.reshape(1, C),
                   w1.astype(cdt), b1.reshape(1, Hd), w1a.astype(cdt),
                   w2b.astype(cdt), b2b.reshape(1, Hd),
                   w2.astype(cdt), b2.reshape(1, C)]

    return dict(full_prefold=full_prefold, C=C, Hd=Hd, Kc=Kc, weights=weights)


# ------------------------------ host wrapper ------------------------------- #

def cross_attn_xr_forward(seq, cmap, prep, *, tm=512):
    B, N, C = seq.shape
    M = B * N
    Kc = cmap.shape[-1]
    assert C == prep["C"] and Kc == prep["Kc"]
    Hd = prep["Hd"]
    weights = prep["weights"]
    full_prefold = prep["full_prefold"]

    # Row tile: multiple of 16 (bf16 sublane packing). No host-side cast/pad of
    # seq/cmap: they stream from HBM in their stored dtype; a ragged last block
    # (M % tm != 0) uses Pallas' padded-block semantics — every output row
    # depends only on its own input row, so padding garbage never leaks into
    # valid rows, and OOB output rows are discarded.
    tm = max(16, _round_up(tm, 16))
    tm_eff = tm if M >= tm else M            # full-extent block for small M
    grid = (pl.cdiv(M, tm_eff),)

    seq2 = seq.reshape(M, C)                 # contiguous reshape: no copy
    cmap2 = cmap.reshape(M, Kc)              # no copy, no cast, Kc unpadded

    kernel = _kernel_prefold if full_prefold else _kernel_narrow
    scratch = [] if full_prefold else [pltpu.VMEM((tm_eff, 2 * C), jnp.float32)]

    # Weights/biases are grid-invariant (constant index_map => DMA'd once);
    # ~0.7 MiB resident, so default double-buffering is harmless VMEM-wise.
    weight_specs = [pl.BlockSpec(w.shape, lambda i: (0, 0)) for w in weights]

    if full_prefold:
        flops = 2 * M * (Kc * Hd + 2 * C * Hd + Hd * Hd + Hd * C)
    else:
        flops = 2 * M * (Kc * C + C * C + 2 * C * Hd + C * Hd + Hd * Hd + Hd * C)
    bytes_accessed = (int(seq2.nbytes) + int(cmap2.nbytes)
                      + M * C * seq.dtype.itemsize
                      + sum(int(w.nbytes) for w in weights))

    out2 = pl.pallas_call(
        kernel,
        out_shape=jax.ShapeDtypeStruct((M, C), seq.dtype),
        grid_spec=pltpu.PrefetchScalarGridSpec(
            num_scalar_prefetch=0,
            grid=grid,
            in_specs=[pl.BlockSpec((tm_eff, C), lambda i: (i, 0)),    # seq rows
                      pl.BlockSpec((tm_eff, Kc), lambda i: (i, 0))]   # cmap rows
                     + weight_specs,
            out_specs=pl.BlockSpec((tm_eff, C), lambda i: (i, 0)),
            scratch_shapes=scratch,
        ),
        compiler_params=pltpu.CompilerParams(
            dimension_semantics=("parallel",)),  # row axis shards across v7x's 2 TCs
        cost_estimate=pl.CostEstimate(
            flops=int(flops),
            transcendentals=int(2 * M * Hd),
            bytes_accessed=int(bytes_accessed)),
    )(seq2, cmap2, *weights)
    # NOTE: C=64 (<128 lanes) keeps the output store masked; the optional
    # (M/2, 128) lane-dense output slab was skipped — bytes are tiny vs. cmap
    # and the in-kernel sublane->lane reshape is not worth the lowering risk.
    return out2.reshape(B, N, C)


# ----------------------- params + pure-JAX reference ----------------------- #

def init_params(key, C, cmap_dim=1000):
    """Deterministic PyTorch-nn.Linear-style init, stored as (in, out)."""
    ks = iter(jax.random.split(key, 12))

    def lin(fan_in, fan_out):
        bound = 1.0 / (fan_in ** 0.5)
        w = jax.random.uniform(next(ks), (fan_in, fan_out), jnp.float32, -bound, bound)
        b = jax.random.uniform(next(ks), (fan_out,), jnp.float32, -bound, bound)
        return w, b

    wcs, bcs = lin(cmap_dim, C)          # cmap_squeeze: 1000 -> C
    wqc, bqc = lin(C, 3 * C)             # qkv_cmap
    wqs, bqs = lin(C, 3 * C)             # qkv_seq
    w1, b1 = lin(2 * C, 4 * C)           # proj.fc1
    w2, b2 = lin(4 * C, C)               # proj.fc2
    return dict(wcs=wcs, bcs=bcs, w_qkv_c=wqc, b_qkv_c=bqc,
                w_qkv_s=wqs, b_qkv_s=bqs, w1=w1, b1=b1, w2=w2, b2=b2)


def reference_forward(seq, cmap, p, num_heads):
    """Literal (un-simplified, f32) re-implementation of the PyTorch forward."""
    B, N, _ = seq.shape
    C = p["wcs"].shape[1]
    H, D = num_heads, C // num_heads

    cmap_sq = cmap @ p["wcs"] + p["bcs"]
    cqkv = (cmap_sq @ p["w_qkv_c"] + p["b_qkv_c"]).reshape(B, N, 3, H, D)
    cqkv = jnp.transpose(cqkv, (2, 0, 3, 1, 4))
    v_c = cqkv[2]
    sqkv = (seq @ p["w_qkv_s"] + p["b_qkv_s"]).reshape(B, N, 3, H, D)
    sqkv = jnp.transpose(sqkv, (2, 0, 3, 1, 4))
    v_s = sqkv[2]
    # attn = softmax(q_s @ k_c^T * scale) is computed then discarded in the
    # PyTorch module (dead code for the output) -> omitted here as well.
    v_ss = jnp.transpose(v_s, (0, 2, 1, 3)).reshape(B, N, C)   # 'f h w c -> f w (h c)'
    v_cc = jnp.transpose(v_c, (0, 2, 1, 3)).reshape(B, N, C)

    def mlp(x):
        h = x @ p["w1"] + p["b1"]
        h = jax.nn.gelu(h, approximate=False)
        return h @ p["w2"] + p["b2"]

    s_c = mlp(jnp.concatenate([v_cc, v_ss], axis=2))
    return mlp(jnp.concatenate([seq, s_c], axis=2))


# ---------------------------------- main ----------------------------------- #

if __name__ == "__main__":
    B, N = 2, 8
    C = 64              # encoder_embed_dim (small for the demo)
    NUM_HEADS = 4       # head_dim = 16
    CMAP_DIM = 1000     # hard-coded by nn.Linear(1000, encoder_embed_dim)

    key = jax.random.PRNGKey(0)
    k_seq, k_cmap, k_par = jax.random.split(key, 3)
    seq = jax.random.normal(k_seq, (B, N, C), jnp.float32)
    cmap = jax.random.normal(k_cmap, (B, N, CMAP_DIM), jnp.float32)
    params = init_params(k_par, C, CMAP_DIM)

    prep = prepare_params(params)                       # folds hoisted, once
    out = cross_attn_xr_forward(seq, cmap, prep, tm=512)
    out = jax.block_until_ready(out)
    assert out.shape == (B, N, C)

    ref = reference_forward(seq, cmap, params, NUM_HEADS)
    max_err = float(jnp.max(jnp.abs(out - ref)))
    assert jnp.allclose(out, ref, atol=2e-2, rtol=2e-2), max_err

    print("KERNEL_OK")
</pallas_src>

<mosaic_0001>
module attributes {stable_mosaic.version = 11 : i64} {
  func.func @_kernel_prefold(%arg0: i32, %arg1: memref<16x64xf32, #tpu.memory_space<vmem>>, %arg2: memref<16x1000xf32, #tpu.memory_space<vmem>>, %arg3: memref<1000x256xbf16, #tpu.memory_space<vmem>>, %arg4: memref<64x256xbf16, #tpu.memory_space<vmem>>, %arg5: memref<64x256xbf16, #tpu.memory_space<vmem>>, %arg6: memref<1x256xf32, #tpu.memory_space<vmem>>, %arg7: memref<256x256xbf16, #tpu.memory_space<vmem>>, %arg8: memref<1x256xf32, #tpu.memory_space<vmem>>, %arg9: memref<256x64xbf16, #tpu.memory_space<vmem>>, %arg10: memref<1x64xf32, #tpu.memory_space<vmem>>, %arg11: memref<16x64xf32, #tpu.memory_space<vmem>>) attributes {dimension_semantics = [#tpu.dimension_semantics<parallel>], iteration_bounds = array<i64: 1>, scalar_prefetch = 0 : i64, scratch_operands = 0 : i64, tpu.core_type = #tpu.core_type<tc>, window_params = [{transform_indices = @transform_0, window_bounds = array<i64: 16, 64>}, {transform_indices = @transform_1, window_bounds = array<i64: 16, 1000>}, {pipeline_mode = #tpu.pipeline_mode<synchronous>, transform_indices = @transform_2, window_bounds = array<i64: 1000, 256>}, {pipeline_mode = #tpu.pipeline_mode<synchronous>, transform_indices = @transform_3, window_bounds = array<i64: 64, 256>}, {pipeline_mode = #tpu.pipeline_mode<synchronous>, transform_indices = @transform_4, window_bounds = array<i64: 64, 256>}, {pipeline_mode = #tpu.pipeline_mode<synchronous>, transform_indices = @transform_5, window_bounds = array<i64: 1, 256>}, {pipeline_mode = #tpu.pipeline_mode<synchronous>, transform_indices = @transform_6, window_bounds = array<i64: 256, 256>}, {pipeline_mode = #tpu.pipeline_mode<synchronous>, transform_indices = @transform_7, window_bounds = array<i64: 1, 256>}, {pipeline_mode = #tpu.pipeline_mode<synchronous>, transform_indices = @transform_8, window_bounds = array<i64: 256, 64>}, {pipeline_mode = #tpu.pipeline_mode<synchronous>, transform_indices = @transform_9, window_bounds = array<i64: 1, 64>}, {transform_indices = @transform_10, window_bounds = array<i64: 16, 64>}]} {
    %c0 = arith.constant 0 : index
    %c0_0 = arith.constant 0 : index
    %0 = vector.load %arg1[%c0, %c0_0] : memref<16x64xf32, #tpu.memory_space<vmem>>, vector<16x64xf32>
    %1 = arith.truncf %0 : vector<16x64xf32> to vector<16x64xbf16>
    %c0_1 = arith.constant 0 : index
    %c0_2 = arith.constant 0 : index
    %2 = vector.load %arg2[%c0_1, %c0_2] : memref<16x1000xf32, #tpu.memory_space<vmem>>, vector<16x1000xf32>
    %3 = arith.truncf %2 : vector<16x1000xf32> to vector<16x1000xbf16>
    %c0_3 = arith.constant 0 : index
    %c0_4 = arith.constant 0 : index
    %4 = vector.load %arg3[%c0_3, %c0_4] : memref<1000x256xbf16, #tpu.memory_space<vmem>>, vector<1000x256xbf16>
    %cst = arith.constant dense<0.000000e+00> : vector<16x256xf32>
    %5 = tpu.matmul %3, %4, %cst {dimension_numbers = #tpu.dot_dimension_numbers<[1], [0], [0], [1], [0, 0, 1, 1], [], []>} : vector<16x1000xbf16>, vector<1000x256xbf16>, vector<16x256xf32> -> vector<16x256xf32>
    %c0_5 = arith.constant 0 : index
    %c0_6 = arith.constant 0 : index
    %6 = vector.load %arg4[%c0_5, %c0_6] : memref<64x256xbf16, #tpu.memory_space<vmem>>, vector<64x256xbf16>
    %cst_7 = arith.constant dense<0.000000e+00> : vector<16x256xf32>
    %7 = tpu.matmul %1, %6, %cst_7 {dimension_numbers = #tpu.dot_dimension_numbers<[1], [0], [0], [1], [0, 0, 1, 1], [], []>} : vector<16x64xbf16>, vector<64x256xbf16>, vector<16x256xf32> -> vector<16x256xf32>
    %8 = arith.addf %5, %7 : vector<16x256xf32>
    %c0_8 = arith.constant 0 : index
    %c0_9 = arith.constant 0 : index
    %9 = vector.load %arg6[%c0_8, %c0_9] : memref<1x256xf32, #tpu.memory_space<vmem>>, vector<1x256xf32>
    %10 = vector.broadcast %9 : vector<1x256xf32> to vector<16x256xf32>
    %11 = arith.addf %8, %10 : vector<16x256xf32>
    %cst_10 = arith.constant 5.000000e-01 : f32
    %12 = vector.broadcast %cst_10 : f32 to vector<16x256xf32>
    %13 = arith.mulf %12, %11 : vector<16x256xf32>
    %14 = arith.mulf %11, %11 : vector<16x256xf32>
    %15 = arith.mulf %14, %11 : vector<16x256xf32>
    %cst_11 = arith.constant 4.471500e-02 : f32
    %16 = vector.broadcast %cst_11 : f32 to vector<16x256xf32>
    %17 = arith.mulf %16, %15 : vector<16x256xf32>
    %18 = arith.addf %11, %17 : vector<16x256xf32>
    %cst_12 = arith.constant 0.797884583 : f32
    %19 = vector.broadcast %cst_12 : f32 to vector<16x256xf32>
    %20 = arith.mulf %19, %18 : vector<16x256xf32>
    %21 = math.tanh %20 : vector<16x256xf32>
    %cst_13 = arith.constant 1.000000e+00 : f32
    %22 = vector.broadcast %cst_13 : f32 to vector<16x256xf32>
    %23 = arith.addf %22, %21 : vector<16x256xf32>
    %24 = arith.mulf %13, %23 : vector<16x256xf32>
    %c0_14 = arith.constant 0 : index
    %c0_15 = arith.constant 0 : index
    %25 = vector.load %arg5[%c0_14, %c0_15] : memref<64x256xbf16, #tpu.memory_space<vmem>>, vector<64x256xbf16>
    %cst_16 = arith.constant dense<0.000000e+00> : vector<16x256xf32>
    %26 = tpu.matmul %1, %25, %cst_16 {dimension_numbers = #tpu.dot_dimension_numbers<[1], [0], [0], [1], [0, 0, 1, 1], [], []>} : vector<16x64xbf16>, vector<64x256xbf16>, vector<16x256xf32> -> vector<16x256xf32>
    %27 = arith.truncf %24 : vector<16x256xf32> to vector<16x256xbf16>
    %c0_17 = arith.constant 0 : index
    %c0_18 = arith.constant 0 : index
    %28 = vector.load %arg7[%c0_17, %c0_18] : memref<256x256xbf16, #tpu.memory_space<vmem>>, vector<256x256xbf16>
    %cst_19 = arith.constant dense<0.000000e+00> : vector<16x256xf32>
    %29 = tpu.matmul %27, %28, %cst_19 {dimension_numbers = #tpu.dot_dimension_numbers<[1], [0], [0], [1], [0, 0, 1, 1], [], []>} : vector<16x256xbf16>, vector<256x256xbf16>, vector<16x256xf32> -> vector<16x256xf32>
    %30 = arith.addf %26, %29 : vector<16x256xf32>
    %c0_20 = arith.constant 0 : index
    %c0_21 = arith.constant 0 : index
    %31 = vector.load %arg8[%c0_20, %c0_21] : memref<1x256xf32, #tpu.memory_space<vmem>>, vector<1x256xf32>
    %32 = vector.broadcast %31 : vector<1x256xf32> to vector<16x256xf32>
    %33 = arith.addf %30, %32 : vector<16x256xf32>
    %cst_22 = arith.constant 5.000000e-01 : f32
    %34 = vector.broadcast %cst_22 : f32 to vector<16x256xf32>
    %35 = arith.mulf %34, %33 : vector<16x256xf32>
    %36 = arith.mulf %33, %33 : vector<16x256xf32>
    %37 = arith.mulf %36, %33 : vector<16x256xf32>
    %cst_23 = arith.constant 4.471500e-02 : f32
    %38 = vector.broadcast %cst_23 : f32 to vector<16x256xf32>
    %39 = arith.mulf %38, %37 : vector<16x256xf32>
    %40 = arith.addf %33, %39 : vector<16x256xf32>
    %cst_24 = arith.constant 0.797884583 : f32
    %41 = vector.broadcast %cst_24 : f32 to vector<16x256xf32>
    %42 = arith.mulf %41, %40 : vector<16x256xf32>
    %43 = math.tanh %42 : vector<16x256xf32>
    %cst_25 = arith.constant 1.000000e+00 : f32
    %44 = vector.broadcast %cst_25 : f32 to vector<16x256xf32>
    %45 = arith.addf %44, %43 : vector<16x256xf32>
    %46 = arith.mulf %35, %45 : vector<16x256xf32>
    %47 = arith.truncf %46 : vector<16x256xf32> to vector<16x256xbf16>
    %c0_26 = arith.constant 0 : index
    %c0_27 = arith.constant 0 : index
    %48 = vector.load %arg9[%c0_26, %c0_27] : memref<256x64xbf16, #tpu.memory_space<vmem>>, vector<256x64xbf16>
    %cst_28 = arith.constant dense<0.000000e+00> : vector<16x64xf32>
    %49 = tpu.matmul %47, %48, %cst_28 {dimension_numbers = #tpu.dot_dimension_numbers<[1], [0], [0], [1], [0, 0, 1, 1], [], []>} : vector<16x256xbf16>, vector<256x64xbf16>, vector<16x64xf32> -> vector<16x64xf32>
    %c0_29 = arith.constant 0 : index
    %c0_30 = arith.constant 0 : index
    %50 = vector.load %arg10[%c0_29, %c0_30] : memref<1x64xf32, #tpu.memory_space<vmem>>, vector<1x64xf32>
    %51 = vector.broadcast %50 : vector<1x64xf32> to vector<16x64xf32>
    %52 = arith.addf %49, %51 : vector<16x64xf32>
    %c0_31 = arith.constant 0 : index
    %c0_32 = arith.constant 0 : index
    %53 = vector.load %arg11[%c0_31, %c0_32] : memref<16x64xf32, #tpu.memory_space<vmem>>, vector<16x64xf32>
    tpu.vector_store %arg11[%c0_31, %c0_32], %52 {strides = array<i32>} : memref<16x64xf32, #tpu.memory_space<vmem>>, vector<16x64xf32>,
    return
  }
  func.func @transform_0(%arg0: i32) -> (i32, i32) {
    %c0_i32 = arith.constant 0 : i32
    %c0_i32_0 = arith.constant 0 : i32
    return %arg0, %c0_i32 : i32, i32
  }
  func.func @transform_1(%arg0: i32) -> (i32, i32) {
    %c0_i32 = arith.constant 0 : i32
    %c0_i32_0 = arith.constant 0 : i32
    return %arg0, %c0_i32 : i32, i32
  }
  func.func @transform_2(%arg0: i32) -> (i32, i32) {
    %c0_i32 = arith.constant 0 : i32
    %c0_i32_0 = arith.constant 0 : i32
    %c0_i32_1 = arith.constant 0 : i32
    return %c0_i32, %c0_i32_0 : i32, i32
  }
  func.func @transform_3(%arg0: i32) -> (i32, i32) {
    %c0_i32 = arith.constant 0 : i32
    %c0_i32_0 = arith.constant 0 : i32
    %c0_i32_1 = arith.constant 0 : i32
    return %c0_i32, %c0_i32_0 : i32, i32
  }
  func.func @transform_4(%arg0: i32) -> (i32, i32) {
    %c0_i32 = arith.constant 0 : i32
    %c0_i32_0 = arith.constant 0 : i32
    %c0_i32_1 = arith.constant 0 : i32
    return %c0_i32, %c0_i32_0 : i32, i32
  }
  func.func @transform_5(%arg0: i32) -> (i32, i32) {
    %c0_i32 = arith.constant 0 : i32
    %c0_i32_0 = arith.constant 0 : i32
    %c0_i32_1 = arith.constant 0 : i32
    return %c0_i32, %c0_i32_0 : i32, i32
  }
  func.func @transform_6(%arg0: i32) -> (i32, i32) {
    %c0_i32 = arith.constant 0 : i32
    %c0_i32_0 = arith.constant 0 : i32
    %c0_i32_1 = arith.constant 0 : i32
    return %c0_i32, %c0_i32_0 : i32, i32
  }
  func.func @transform_7(%arg0: i32) -> (i32, i32) {
    %c0_i32 = arith.constant 0 : i32
    %c0_i32_0 = arith.constant 0 : i32
    %c0_i32_1 = arith.constant 0 : i32
    return %c0_i32, %c0_i32_0 : i32, i32
  }
  func.func @transform_8(%arg0: i32) -> (i32, i32) {
    %c0_i32 = arith.constant 0 : i32
    %c0_i32_0 = arith.constant 0 : i32
    %c0_i32_1 = arith.constant 0 : i32
    return %c0_i32, %c0_i32_0 : i32, i32
  }
  func.func @transform_9(%arg0: i32) -> (i32, i32) {
    %c0_i32 = arith.constant 0 : i32
    %c0_i32_0 = arith.constant 0 : i32
    %c0_i32_1 = arith.constant 0 : i32
    return %c0_i32, %c0_i32_0 : i32, i32
  }
  func.func @transform_10(%arg0: i32) -> (i32, i32) {
    %c0_i32 = arith.constant 0 : i32
    %c0_i32_0 = arith.constant 0 : i32
    return %arg0, %c0_i32 : i32, i32
  }
}

</mosaic_0001>

<bundles_post_ra>
// kernel: tpu_custom_call.1
= control target key start
LH: loop header
LB: loop body
LE: loop exit
PB: predicated region body
PF: predicated region fallthrough
CT: control target
= control target key end

     0   :  { %15 = vsyncpa [#allocation3], 0  ;;  %s3200_s0 = inlined_call_operand.hbm [shape: f32[16,64], index: 0, kind: input, shape index: {}]   ;;  %s3201_s1 = inlined_call_operand.vmem [shape: f32[16,1000], index: 1, kind: input, shape index: {}]   ;;  %s3202_s2 = inlined_call_operand.hbm [shape: bf16[1000,256], index: 2, kind: input, shape index: {}]   ;;  %s3203_s3 = inlined_call_operand.vmem [shape: bf16[64,256], index: 3, kind: input, shape index: {}]   ;;  %s3204_s4 = inlined_call_operand.hbm [shape: bf16[64,256], index: 4, kind: input, shape index: {}]   ;;  %s3205_s5 = inlined_call_operand.vmem [shape: f32[1,256], index: 5, kind: input, shape index: {}]   ;;  %s3206_s6 = inlined_call_operand.hbm [shape: bf16[256,256], index: 6, kind: input, shape index: {}]   ;;  %s3207_s7 = inlined_call_operand.vmem [shape: f32[1,256], index: 7, kind: input, shape index: {}]   ;;  %s3208_s8 = inlined_call_operand.vmem [shape: bf16[256,64], index: 8, kind: input, shape index: {}]   ;;  %s3209_s9 = inlined_call_operand.vmem [shape: f32[1,64], index: 9, kind: input, shape index: {}]   ;;  %s3210_s10 = inlined_call_operand.hbm [shape: f32[16,64], index: 10, kind: output, shape index: {}]  }
   0x1   :  { %16 = vsyncpa [#allocation6], 0 }
   0x2   :  { %17 = vsyncpa [#allocation9], 0 }
   0x3   :  { %18 = vsyncpa [#allocation4], 0  ;;  %s38_s15 = sshll.u32 %s3202_s2, 4  ;;  %s2893_s16 = smov [#allocation5]   ;;  %s39_s15 = int_to_ptr.hbm [resolvable:$true] %s38_s15 }
   0x4   :  { %s40_s17 = sshll.u32 %s2893_s16, 4  ;;  %s23_s20 = sshll.u32 %s3200_s0, 4  ;;  %s41_s17 = int_to_ptr.vmem [resolvable:$true] %s40_s17  ;;  %s24_s20 = int_to_ptr.hbm [resolvable:$true] %s23_s20 }
   0x5   :  { %s2894_s21 = smov 128   ;;  %s2895_s22 = smov 8  }
   0x6   :  { %46 = dma.hbm_to_vmem [thread:$0]  %s39_s15, 16000, %s41_s17, [#allocation6], %s2894_s21, %s2894_s21, %s2895_s22  }
   0x7   :  { %s2896_s23 = smov [#allocation2]   ;;  %s53_s2 = sshll.u32 %s3204_s4, 4  ;;  %s54_s2 = int_to_ptr.hbm [resolvable:$true] %s53_s2 }
   0x8   :  { %s25_s24 = sshll.u32 %s2896_s23, 4  ;;  %s68_s28 = sshll.u32 %s3206_s6, 4  ;;  %s26_s24 = int_to_ptr.vmem [resolvable:$true] %s25_s24  ;;  %s69_s28 = int_to_ptr.hbm [resolvable:$true] %s68_s28 }
   0x9   :  { %31 = dma.hbm_to_vmem [thread:$0]  %s24_s20, 256, %s26_s24, [#allocation3], %s2894_s21, %s2894_s21, %s2895_s22  }
   0xa   :  { %s2897_s29 = smov [#allocation7]   ;;  %s2898_s11 = smov [#allocation8]  }
   0xb   :  { %s55_s30 = sshll.u32 %s2897_s29, 4  ;;  %s70_s4 = sshll.u32 %s2898_s11, 4  ;;  %s56_s30 = int_to_ptr.vmem [resolvable:$true] %s55_s30  ;;  %s71_s4 = int_to_ptr.vmem [resolvable:$true] %s70_s4 }
   0xc   :  { %61 = dma.hbm_to_vmem [thread:$0]  %s54_s2, 1024, %s56_s30, [#allocation6], %s2894_s21, %s2894_s21, %s2895_s22  }
   0xd   :  { %76 = dma.hbm_to_vmem [thread:$0]  %s69_s28, 4096, %s71_s4, [#allocation9], %s2894_s21, %s2894_s21, %s2895_s22  }
   0xe   :  { %2885 = dma.done.wait [#allocation3], 256  }
   0xf   :  { %2886 = vsyncadd [#allocation3], 4294967040 }
  0x10   :  { %2887 = dma.done.wait [#allocation6], 17024  }
  0x11   :  { %2888 = vsyncadd [#allocation6], 4294950272 }
  0x12   :  { %2889 = dma.done.wait [#allocation9], 4096  }
  0x13   :  { %2890 = vsyncadd [#allocation9], 4294963200  ;;  %v1821_v0 = vld [vmem:[%s3203_s3 + $0x30] sm:$0xf]  ;;  %v2684_v1 = vld [vmem:[%s3203_s3 + $0x34] sm:$0xf0] }
  0x14   :  { %v2683_v2 = vld [vmem:[%s3203_s3 + $0x34] sm:$0xf]  ;;  %v1822_v3 = vor.u32 %v2684_v1, %v1821_v0  ;;  %v1823_v4 = vld [vmem:[%s3203_s3 + $0x38] sm:$0xf0]  ;;  %v1813_v5 = vld [vmem:[%s3203_s3 + $0x20] sm:$0xf] }
  0x15   :  { %v2682_v6 = vld [vmem:[%s3203_s3 + $0x24] sm:$0xf0]  ;;  %v1826_v7 = vor.u32 %v2683_v2, %v1823_v4  ;;  %v2681_v8 = vld [vmem:[%s3203_s3 + $0x24] sm:$0xf]  ;;  %v1815_v9 = vld [vmem:[%s3203_s3 + $0x28] sm:$0xf0] }
  0x16   :  { %308 = vmatpush.bf16.msra.mxu2 %v1822_v3  ;;  %v1814_v10 = vor.u32 %v2682_v6, %v1813_v5  ;;  %v1818_v11 = vor.u32 %v2681_v8, %v1815_v9  ;;  %v1805_v12 = vld [vmem:[%s3203_s3 + $0x10] sm:$0xf]  ;;  %v2680_v13 = vld [vmem:[%s3203_s3 + $0x14] sm:$0xf0]  ;;  %v2679_v14 = vld [vmem:[%s3203_s3 + $0x14] sm:$0xf] }
  0x17   :  { %322 = vmatpush.bf16.msra.mxu3 %v1826_v7  ;;  %v1807_v15 = vld [vmem:[%s3203_s3 + $0x18] sm:$0xf0]  ;;  %v1797_v16 = vld [vmem:[%s3203_s3] sm:$0xf]  ;;  %v1806_v17 = vor.u32 %v2680_v13, %v1805_v12  ;;  %v2678_v18 = vld [vmem:[%s3203_s3 + $0x4] sm:$0xf0] }
  0x18   :  { %v2677_v19 = vld [vmem:[%s3203_s3 + $0x4] sm:$0xf]  ;;  %v1799_v20 = vld [vmem:[%s3203_s3 + $0x8] sm:$0xf0]  ;;  %v1810_v21 = vor.u32 %v2679_v14, %v1807_v15  ;;  %v1887_v22 = vld [vmem:[#allocation5 + $0x70] sm:$0xf]  ;;  %v1798_v32 = vor.u32 %v2678_v18, %v1797_v16 }
  0x19   :  { %v2079_v23 = vld [vmem:[#allocation5 + $0x1f0] sm:$0xf]  ;;  %v2616_v24 = vld [vmem:[#allocation5 + $0x1f4] sm:$0xf0]  ;;  %v2071_v31 = vld [vmem:[#allocation5 + $0x1e0] sm:$0xf]  ;;  %v1802_v36 = vor.u32 %v2677_v19, %v1799_v20 }
  0x1a   :  { %309 = vmatpush.bf16.msra.mxu2 %v1814_v10  ;;  %v2568_v25 = vld [vmem:[#allocation5 + $0x74] sm:$0xf0]  ;;  %v1951_v26 = vld [vmem:[#allocation5 + $0xf0] sm:$0xf]  ;;  %v2080_v28 = vor.u32 %v2616_v24, %v2079_v23  ;;  %v1879_v33 = vld [vmem:[#allocation5 + $0x60] sm:$0xf] }
  0x1b   :  { %323 = vmatpush.bf16.msra.mxu3 %v1818_v11  ;;  %v2584_v27 = vld [vmem:[#allocation5 + $0xf4] sm:$0xf0]  ;;  %v2015_v29 = vld [vmem:[#allocation5 + $0x170] sm:$0xf]  ;;  %v2614_v35 = vld [vmem:[#allocation5 + $0x1e4] sm:$0xf0]  ;;  %v1888_v37 = vor.u32 %v2568_v25, %v1887_v22 }
  0x1c   :  { %v2600_v30 = vld [vmem:[#allocation5 + $0x174] sm:$0xf0]  ;;  %1010 = vmatpush.bf16.msra.mxu1 %v2080_v28  ;;  %v2566_v38 = vld [vmem:[#allocation5 + $0x64] sm:$0xf0]  ;;  %v1943_v39 = vld [vmem:[#allocation5 + $0xe0] sm:$0xf]  ;;  %v2072_v40 = vor.u32 %v2614_v35, %v2071_v31  ;;  %v1952_v42 = vor.u32 %v2584_v27, %v1951_v26 }
  0x1d   :  { %v2016_v34 = vor.u32 %v2600_v30, %v2015_v29  ;;  %v2007_v41 = vld [vmem:[#allocation5 + $0x160] sm:$0xf]  ;;  %v2598_v43 = vld [vmem:[#allocation5 + $0x164] sm:$0xf0]  ;;  %v2063_v44 = vld [vmem:[#allocation5 + $0x1d0] sm:$0xf]  ;;  %v1880_v52 = vor.u32 %v2566_v38, %v1879_v33 }
  0x1e   :  { %310 = vmatpush.bf16.msra.mxu2 %v1806_v17  ;;  %v2612_v45 = vld [vmem:[#allocation5 + $0x1d4] sm:$0xf0]  ;;  %v2582_v46 = vld [vmem:[#allocation5 + $0xe4] sm:$0xf0]  ;;  %v2008_v47 = vor.u32 %v2598_v43, %v2007_v41  ;;  %v100_v48 = vld [vmem:[#allocation2] sm:$0xff]  ;;  %vm300_vm0 = vcmask 523264  }
  0x1f   :  { %324 = vmatpush.bf16.msra.mxu3 %v1810_v21  ;;  %996 = vmatpush.bf16.msra.mxu0 %v2016_v34  ;;  %v101_v49 = vld [vmem:[#allocation2 + $0x8] sm:$0xff]  ;;  %v2064_v50 = vor.u32 %v2612_v45, %v2063_v44  ;;  %v1999_v53 = vld [vmem:[#allocation5 + $0x150] sm:$0xf]  ;;  %v2055_v55 = vld [vmem:[#allocation5 + $0x1c0] sm:$0xf]  ;;  %v1944_v56 = vor.u32 %v2582_v46, %v1943_v39  ;;  %vm961_vm1 = vcmask 1043456  }
  0x20   :  { %1011 = vmatpush.bf16.msra.mxu1 %v2072_v40  ;;  %v3027_v51 = vpack.c.bf16 %v101_v49, %v100_v48  ;;  %v2596_v54 = vld [vmem:[#allocation5 + $0x154] sm:$0xf0]  ;;  %v1871_v57 = vld [vmem:[#allocation5 + $0x50] sm:$0xf]  ;;  %v2610_v60 = vld [vmem:[#allocation5 + $0x1c4] sm:$0xf0] }
  0x21   :  { %v2564_v58 = vld [vmem:[#allocation5 + $0x54] sm:$0xf0]  ;;  %v2000_v59 = vor.u32 %v2596_v54, %v1999_v53  ;;  %v1935_v61 = vld [vmem:[#allocation5 + $0xd0] sm:$0xf]  ;;  %v1991_v63 = vld [vmem:[#allocation5 + $0x140] sm:$0xf]  ;;  %v2056_v0 = vor.u32 %v2610_v60, %v2055_v55 }
  0x22   :  { %311 = vmatpush.bf16.msra.mxu2 %v1798_v32  ;;  %v2580_v62 = vld [vmem:[#allocation5 + $0xd4] sm:$0xf0]  ;;  %v2594_v1 = vld [vmem:[#allocation5 + $0x144] sm:$0xf0]  ;;  %v1872_v2 = vor.u32 %v2564_v58, %v1871_v57  ;;  %v2047_v3 = vld [vmem:[#allocation5 + $0x1b0] sm:$0xf] }
  0x23   :  { %325 = vmatpush.bf16.msra.mxu3 %v1802_v36  ;;  %997 = vmatpush.bf16.msra.mxu0 %v2008_v47  ;;  %v2608_v4 = vld [vmem:[#allocation5 + $0x1b4] sm:$0xf0]  ;;  %v1936_v5 = vor.u32 %v2580_v62, %v1935_v61  ;;  %v1863_v6 = vld [vmem:[#allocation5 + $0x40] sm:$0xf]  ;;  %v2562_v7 = vld [vmem:[#allocation5 + $0x44] sm:$0xf0]  ;;  %v1992_v9 = vor.u32 %v2594_v1, %v1991_v63 }
  0x24   :  { %1012 = vmatpush.bf16.msra.mxu1 %v2064_v50  ;;  %v1927_v8 = vld [vmem:[#allocation5 + $0xc0] sm:$0xf]  ;;  %v2578_v10 = vld [vmem:[#allocation5 + $0xc4] sm:$0xf0]  ;;  %v1983_v11 = vld [vmem:[#allocation5 + $0x130] sm:$0xf]  ;;  %v2048_v13 = vor.u32 %v2608_v4, %v2047_v3  ;;  %v1864_v14 = vor.u32 %v2562_v7, %v1863_v6 }
  0x25   :  { %1827 = vmatmul.msk.bf16.vlgmr.msra.gmra.mxu2 %vm300_vm0, %v3027_v51  ;;  %v2592_v12 = vld [vmem:[#allocation5 + $0x134] sm:$0xf0]  ;;  %v2039_v15 = vld [vmem:[#allocation5 + $0x1a0] sm:$0xf]  ;;  %v2606_v16 = vld [vmem:[#allocation5 + $0x1a4] sm:$0xf0]  ;;  %v1928_v17 = vor.u32 %v2578_v10, %v1927_v8 }
  0x26   :  { %968 = vmatpush.bf16.msrb.mxu2 %v1888_v37  ;;  %1828 = vmatmul.msk.bf16.vlgmr.msra.gmra.mxu3 %vm300_vm0, %v3027_v51  ;;  %v1855_v18 = vld [vmem:[#allocation5 + $0x30] sm:$0xf]  ;;  %v2560_v19 = vld [vmem:[#allocation5 + $0x34] sm:$0xf0]  ;;  %v1984_v21 = vor.u32 %v2592_v12, %v1983_v11  ;;  %v1975_v23 = vld [vmem:[#allocation5 + $0x120] sm:$0xf]  ;;  %v2040_v25 = vor.u32 %v2606_v16, %v2039_v15 }
  0x27   :  { %982 = vmatpush.bf16.msrb.mxu3 %v1952_v42  ;;  %998 = vmatpush.bf16.msra.mxu0 %v2000_v59  ;;  %v1919_v20 = vld [vmem:[#allocation5 + $0xb0] sm:$0xf]  ;;  %v2576_v22 = vld [vmem:[#allocation5 + $0xb4] sm:$0xf0]  ;;  %v2590_v24 = vld [vmem:[#allocation5 + $0x124] sm:$0xf0]  ;;  %v1856_v26 = vor.u32 %v2560_v19, %v1855_v18 }
  0x28   :  { %1013 = vmatpush.bf16.msra.mxu1 %v2056_v0  ;;  %v1847_v27 = vld [vmem:[#allocation5 + $0x20] sm:$0xf]  ;;  %v2031_v28 = vld [vmem:[#allocation5 + $0x190] sm:$0xf]  ;;  %v2604_v29 = vld [vmem:[#allocation5 + $0x194] sm:$0xf0]  ;;  %v1920_v30 = vor.u32 %v2576_v22, %v1919_v20  ;;  %v1976_v34 = vor.u32 %v2590_v24, %v1975_v23 }
  0x29   :  { %v2558_v31 = vld [vmem:[#allocation5 + $0x24] sm:$0xf0]  ;;  %v1911_v32 = vld [vmem:[#allocation5 + $0xa0] sm:$0xf]  ;;  %v1967_v35 = vld [vmem:[#allocation5 + $0x110] sm:$0xf]  ;;  %v2032_v38 = vor.u32 %v2604_v29, %v2031_v28 }
  0x2a   :  { %969 = vmatpush.bf16.msrb.mxu2 %v1880_v52  ;;  %v2574_v33 = vld [vmem:[#allocation5 + $0xa4] sm:$0xf0]  ;;  %v2588_v36 = vld [vmem:[#allocation5 + $0x114] sm:$0xf0]  ;;  %v3033_v37 = vld [vmem:[#allocation5 + $0x3e0] sm:$0xff]  ;;  %v1848_v40 = vor.u32 %v2558_v31, %v1847_v27  ;;  %vm957_vm2 = vcmask 850944  }
  0x2b   :  { %983 = vmatpush.bf16.msrb.mxu3 %v1944_v56  ;;  %999 = vmatpush.bf16.msra.mxu0 %v1992_v9  ;;  %v705_v39 = vunpack.c.l.b16 %v3033_v37  ;;  %v1839_v41 = vld [vmem:[#allocation5 + $0x10] sm:$0xf]  ;;  %v2023_v42 = vld [vmem:[#allocation5 + $0x180] sm:$0xf]  ;;  %v2602_v43 = vld [vmem:[#allocation5 + $0x184] sm:$0xf0]  ;;  %v1912_v44 = vor.u32 %v2574_v33, %v1911_v32  ;;  %v1968_v48 = vor.u32 %v2588_v36, %v1967_v35 }
  0x2c   :  { %1014 = vmatpush.bf16.msra.mxu1 %v2048_v13  ;;  %v2556_v45 = vld [vmem:[#allocation5 + $0x14] sm:$0xf0]  ;;  %v1903_v46 = vld [vmem:[#allocation5 + $0x90] sm:$0xf]  ;;  %v1959_v50 = vld [vmem:[#allocation5 + $0x100] sm:$0xf]  ;;  %v2024_v55 = vor.u32 %v2602_v43, %v2023_v42 }
  0x2d   :  { %v2572_v47 = vld [vmem:[#allocation5 + $0x94] sm:$0xf0]  ;;  %v831_v49 = vpack.c.b16 %v705_v39, %v705_v39  ;;  %v2586_v52 = vld [vmem:[#allocation5 + $0x104] sm:$0xf0]  ;;  %v1831_v53 = vld [vmem:[#allocation5] sm:$0xf]  ;;  %v1840_v58 = vor.u32 %v2556_v45, %v1839_v41 }
  0x2e   :  { %970 = vmatpush.bf16.msrb.mxu2 %v1872_v2  ;;  %v2554_v54 = vld [vmem:[#allocation5 + $0x4] sm:$0xf0]  ;;  %v2271_v56 = vld [vmem:[#allocation5 + $0x370] sm:$0xf]  ;;  %v2664_v57 = vld [vmem:[#allocation5 + $0x374] sm:$0xf0]  ;;  %v1904_v0 = vor.u32 %v2572_v47, %v1903_v46  ;;  %v1960_v2 = vor.u32 %v2586_v52, %v1959_v50 }
  0x2f   :  { %984 = vmatpush.bf16.msrb.mxu3 %v1936_v5  ;;  %1000 = vmatpush.bf16.msra.mxu0 %v1984_v21  ;;  %v1895_v59 = vld [vmem:[#allocation5 + $0x80] sm:$0xf]  ;;  %v2570_v60 = vld [vmem:[#allocation5 + $0x84] sm:$0xf0]  ;;  %v2143_v61 = vld [vmem:[#allocation5 + $0x270] sm:$0xf]  ;;  %v2272_v9 = vor.u32 %v2664_v57, %v2271_v56 }
  0x30   :  { %1015 = vmatpush.bf16.msra.mxu1 %v2040_v25  ;;  %v2632_v62 = vld [vmem:[#allocation5 + $0x274] sm:$0xf0]  ;;  %v2319_v63 = vld [vmem:[#allocation5 + $0x3d0] sm:$0xf]  ;;  %v963_v1 = vsel %vm961_vm1, %v831_v49, 0  ;;  %v106_v4 = vld [vmem:[%s3201_s1 + $0x18] sm:$0xff]  ;;  %v1896_v19 = vor.u32 %v2570_v60, %v1895_v59 }
  0x31   :  { %v2676_v3 = vld [vmem:[#allocation5 + $0x3d4] sm:$0xf0]  ;;  %v114_v5 = vld [vmem:[%s3201_s1 + $0x58] sm:$0xff]  ;;  %v2207_v6 = vld [vmem:[#allocation5 + $0x2f0] sm:$0xf]  ;;  %v2144_v20 = vor.u32 %v2632_v62, %v2143_v61  ;;  %s2899_s16 = smov [#allocation10]  }
  0x32   :  { %971 = vmatpush.bf16.msrb.mxu2 %v1864_v14  ;;  %v2648_v7 = vld [vmem:[#allocation5 + $0x2f4] sm:$0xf0]  ;;  %v103_v8 = vld [vmem:[%s3201_s1] sm:$0xff]  ;;  %v3046_v10 = vpack.c.bf16 %v114_v5, %v106_v4  ;;  %v105_v12 = vld [vmem:[%s3201_s1 + $0x10] sm:$0xff]  ;;  %v1832_v14 = vor.u32 %v2554_v54, %v1831_v53  ;;  %v2320_v16 = vor.u32 %v2676_v3, %v2319_v63  ;;  %s1778_s17 = sshll.u32 %s2899_s16, 4  ;;  %s1780_s20 = sshll.u32 %s3210_s10, 4  ;;  %s1779_s17 = int_to_ptr.vmem [resolvable:$true] %s1778_s17  ;;  %s1781_s20 = int_to_ptr.hbm [resolvable:$true] %s1780_s20 }
  0x33   :  { %985 = vmatpush.bf16.msrb.mxu3 %v1928_v17  ;;  %1001 = vmatpush.bf16.msra.mxu0 %v1976_v34  ;;  %v111_v11 = vld [vmem:[%s3201_s1 + $0x40] sm:$0xff]  ;;  %v113_v13 = vld [vmem:[%s3201_s1 + $0x50] sm:$0xff]  ;;  %v104_v15 = vld [vmem:[%s3201_s1 + $0x8] sm:$0xff]  ;;  %v2208_v24 = vor.u32 %v2648_v7, %v2207_v6 }
  0x34   :  { %1016 = vmatpush.bf16.msra.mxu1 %v2032_v38  ;;  %v2263_v17 = vld [vmem:[#allocation5 + $0x360] sm:$0xf]  ;;  %v2662_v18 = vld [vmem:[#allocation5 + $0x364] sm:$0xf0]  ;;  %v112_v21 = vld [vmem:[%s3201_s1 + $0x48] sm:$0xff]  ;;  %v3063_v27 = vpack.c.bf16 %v113_v13, %v105_v12  ;;  %v3066_v28 = vpack.c.bf16 %v111_v11, %v103_v8 }
  0x35   :  { %v2311_v22 = vld [vmem:[#allocation5 + $0x3c0] sm:$0xf]  ;;  %v2674_v23 = vld [vmem:[#allocation5 + $0x3c4] sm:$0xf0]  ;;  %v2264_v31 = vor.u32 %v2662_v18, %v2263_v17  ;;  %v3068_v32 = vpack.c.bf16 %v112_v21, %v104_v15  ;;  %v2255_v34 = vld [vmem:[#allocation5 + $0x350] sm:$0xf] }
  0x36   :  { %972 = vmatpush.bf16.msrb.mxu2 %v1856_v26  ;;  %v2135_v25 = vld [vmem:[#allocation5 + $0x260] sm:$0xf]  ;;  %v2630_v26 = vld [vmem:[#allocation5 + $0x264] sm:$0xf0]  ;;  %v2312_v33 = vor.u32 %v2674_v23, %v2311_v22  ;;  %v2660_v35 = vld [vmem:[#allocation5 + $0x354] sm:$0xf0] }
  0x37   :  { %986 = vmatpush.bf16.msrb.mxu3 %v1920_v30  ;;  %1002 = vmatpush.bf16.msra.mxu0 %v1968_v48  ;;  %v2199_v29 = vld [vmem:[#allocation5 + $0x2e0] sm:$0xf]  ;;  %v2646_v30 = vld [vmem:[#allocation5 + $0x2e4] sm:$0xf0]  ;;  %v2136_v36 = vor.u32 %v2630_v26, %v2135_v25  ;;  %v2303_v38 = vld [vmem:[#allocation5 + $0x3b0] sm:$0xf]  ;;  %v2256_v45 = vor.u32 %v2660_v35, %v2255_v34 }
  0x38   :  { %1017 = vmatpush.bf16.msra.mxu1 %v2024_v55  ;;  %v2672_v39 = vld [vmem:[#allocation5 + $0x3b4] sm:$0xf0]  ;;  %v2127_v41 = vld [vmem:[#allocation5 + $0x250] sm:$0xf]  ;;  %v2247_v47 = vld [vmem:[#allocation5 + $0x340] sm:$0xf] }
  0x39   :  { %v2628_v42 = vld [vmem:[#allocation5 + $0x254] sm:$0xf0]  ;;  %v2191_v43 = vld [vmem:[#allocation5 + $0x2d0] sm:$0xf]  ;;  %v2304_v46 = vor.u32 %v2672_v39, %v2303_v38  ;;  %v2658_v48 = vld [vmem:[#allocation5 + $0x344] sm:$0xf0] }
  0x3a   :  { %973 = vmatpush.bf16.msrb.mxu2 %v1848_v40  ;;  %v2200_v40 = vor.u32 %v2646_v30, %v2199_v29  ;;  %v2128_v49 = vor.u32 %v2628_v42, %v2127_v41  ;;  %v2295_v50 = vld [vmem:[#allocation5 + $0x3a0] sm:$0xf]  ;;  %v2670_v52 = vld [vmem:[#allocation5 + $0x3a4] sm:$0xf0]  ;;  %v2239_v60 = vld [vmem:[#allocation5 + $0x330] sm:$0xf] }
  0x3b   :  { %987 = vmatpush.bf16.msrb.mxu3 %v1912_v44  ;;  %1003 = vmatpush.bf16.msra.mxu0 %v1960_v2  ;;  %v2644_v44 = vld [vmem:[#allocation5 + $0x2d4] sm:$0xf0]  ;;  %v2119_v54 = vld [vmem:[#allocation5 + $0x240] sm:$0xf]  ;;  %v2626_v55 = vld [vmem:[#allocation5 + $0x244] sm:$0xf0]  ;;  %v2296_v59 = vor.u32 %v2670_v52, %v2295_v50 }
  0x3c   :  { %1067 = vmatpush.bf16.msrb.mxu1 %v963_v1  ;;  %v2192_v53 = vor.u32 %v2644_v44, %v2191_v43  ;;  %v2183_v56 = vld [vmem:[#allocation5 + $0x2c0] sm:$0xf]  ;;  %v2642_v57 = vld [vmem:[#allocation5 + $0x2c4] sm:$0xf0]  ;;  %v2656_v61 = vld [vmem:[#allocation5 + $0x334] sm:$0xf0]  ;;  %v2120_v62 = vor.u32 %v2626_v55, %v2119_v54 }
  0x3d   :  { %1018 = vmatmul.bf16.vlgmr.msra.gmra.mxu1 %v3046_v10  ;;  %v2287_v63 = vld [vmem:[#allocation5 + $0x390] sm:$0xf]  ;;  %v2184_v1 = vor.u32 %v2642_v57, %v2183_v56  ;;  %v2624_v3 = vld [vmem:[#allocation5 + $0x234] sm:$0xf0]  ;;  %v2240_v6 = vor.u32 %v2656_v61, %v2239_v60  ;;  %v2231_v8 = vld [vmem:[#allocation5 + $0x320] sm:$0xf] }
  0x3e   :  { %974 = vmatpush.bf16.msrb.mxu2 %v1840_v58  ;;  %1004 = vmatmul.bf16.vlgmr.msra.gmra.mxu0 %v3063_v27  ;;  %v2248_v58 = vor.u32 %v2658_v48, %v2247_v47  ;;  %v2111_v2 = vld [vmem:[#allocation5 + $0x230] sm:$0xf]  ;;  %v2640_v5 = vld [vmem:[#allocation5 + $0x2b4] sm:$0xf0]  ;;  %v2103_v12 = vld [vmem:[#allocation5 + $0x220] sm:$0xf] }
  0x3f   :  { %988 = vmatpush.bf16.msrb.mxu3 %v1904_v0  ;;  %1052 = vmatpush.bf16.msrb.mxu0 %v2272_v9  ;;  %v2668_v0 = vld [vmem:[#allocation5 + $0x394] sm:$0xf0]  ;;  %v2175_v4 = vld [vmem:[#allocation5 + $0x2b0] sm:$0xf]  ;;  %v2654_v9 = vld [vmem:[#allocation5 + $0x324] sm:$0xf0]  ;;  %v2112_v11 = vor.u32 %v2624_v3, %v2111_v2 }
  0x40   :  { %1068 = vmatpush.bf16.msrb.mxu1 %v2320_v16  ;;  %v2288_v7 = vor.u32 %v2668_v0, %v2287_v63  ;;  %v2279_v13 = vld [vmem:[#allocation5 + $0x380] sm:$0xf]  ;;  %v2176_v15 = vor.u32 %v2640_v5, %v2175_v4  ;;  %v2622_v16 = vld [vmem:[#allocation5 + $0x224] sm:$0xf0]  ;;  %v2599_v17 = vld [vmem:[#allocation5 + $0x174] sm:$0xf]  ;;  %v2232_v21 = vor.u32 %v2654_v9, %v2231_v8 }
  0x41   :  { %v2017_v18 = vld [vmem:[#allocation5 + $0x178] sm:$0xf0]  ;;  %v2223_v23 = vld [vmem:[#allocation5 + $0x310] sm:$0xf]  ;;  %v2104_v25 = vor.u32 %v2622_v16, %v2103_v12  ;;  %v110_v30 = vld [vmem:[%s3201_s1 + $0x38] sm:$0xff] }
  0x42   :  { %975 = vmatpush.bf16.msrb.mxu2 %v1832_v14  ;;  %v2666_v14 = vld [vmem:[#allocation5 + $0x384] sm:$0xf0]  ;;  %v2095_v26 = vld [vmem:[#allocation5 + $0x210] sm:$0xf]  ;;  %v2020_v29 = vor.u32 %v2599_v17, %v2017_v18  ;;  %v2620_v34 = vld [vmem:[#allocation5 + $0x214] sm:$0xf0] }
  0x43   :  { %989 = vmatpush.bf16.msrb.mxu3 %v1896_v19  ;;  %1053 = vmatpush.bf16.msrb.mxu0 %v2264_v31  ;;  %v2167_v19 = vld [vmem:[#allocation5 + $0x2a0] sm:$0xf]  ;;  %v2280_v22 = vor.u32 %v2666_v14, %v2279_v13  ;;  %v118_v31 = vld [vmem:[%s3201_s1 + $0x78] sm:$0xff]  ;;  %v2597_v35 = vld [vmem:[#allocation5 + $0x164] sm:$0xf] }
  0x44   :  { %1069 = vmatpush.bf16.msrb.mxu1 %v2312_v33  ;;  %v2159_v38 = vld [vmem:[#allocation5 + $0x290] sm:$0xf]  ;;  %v2636_v39 = vld [vmem:[#allocation5 + $0x294] sm:$0xf0]  ;;  %v3079_v41 = vpack.c.bf16 %v118_v31, %v110_v30  ;;  %v2087_v42 = vld [vmem:[#allocation5 + $0x200] sm:$0xf] }
  0x45   :  { %976 = vmatmul.bf16.vlgmr.msrb.gmra.mxu2 %v3066_v28  ;;  %v2618_v43 = vld [vmem:[#allocation5 + $0x204] sm:$0xf0]  ;;  %v2215_v44 = vld [vmem:[#allocation5 + $0x300] sm:$0xf]  ;;  %v2615_v52 = vld [vmem:[#allocation5 + $0x1f4] sm:$0xf]  ;;  %v2160_v54 = vor.u32 %v2636_v39, %v2159_v38 }
  0x46   :  { %1024 = vmatpush.bf16.msra.mxu2 %v2144_v20  ;;  %990 = vmatmul.bf16.vlgmr.msrb.gmra.mxu3 %v3068_v32  ;;  %v2638_v20 = vld [vmem:[#allocation5 + $0x2a4] sm:$0xf0]  ;;  %v2151_v47 = vld [vmem:[#allocation5 + $0x280] sm:$0xf]  ;;  %v1889_v55 = vld [vmem:[#allocation5 + $0x78] sm:$0xf0]  ;;  %v2088_v2 = vor.u32 %v2618_v43, %v2087_v42 }
  0x47   :  { %1038 = vmatpush.bf16.msra.mxu3 %v2208_v24  ;;  %1054 = vmatpush.bf16.msrb.mxu0 %v2256_v45  ;;  %v2652_v24 = vld [vmem:[#allocation5 + $0x314] sm:$0xf0]  ;;  %v2168_v33 = vor.u32 %v2638_v20, %v2167_v19  ;;  %v2650_v45 = vld [vmem:[#allocation5 + $0x304] sm:$0xf0]  ;;  %v2595_v56 = vld [vmem:[#allocation5 + $0x154] sm:$0xf] }
  0x48   :  { %1070 = vmatpush.bf16.msrb.mxu1 %v2304_v46  ;;  %v2096_v46 = vor.u32 %v2620_v34, %v2095_v26  ;;  %v2634_v48 = vld [vmem:[#allocation5 + $0x284] sm:$0xf0]  ;;  %v2001_v57 = vld [vmem:[#allocation5 + $0x158] sm:$0xf0]  ;;  %v107_v60 = vld [vmem:[%s3201_s1 + $0x20] sm:$0xff]  ;;  %v2216_v61 = vor.u32 %v2650_v45, %v2215_v44 }
  0x49   :  { %v109_v0 = vld [vmem:[%s3201_s1 + $0x30] sm:$0xff]  ;;  %v108_v3 = vld [vmem:[%s3201_s1 + $0x28] sm:$0xff]  ;;  %v2004_v4 = vor.u32 %v2595_v56, %v2001_v57  ;;  %v1993_v12 = vld [vmem:[#allocation5 + $0x148] sm:$0xf0] }
  0x4a   :  { %1025 = vmatpush.bf16.msra.mxu2 %v2136_v36  ;;  %v2009_v36 = vld [vmem:[#allocation5 + $0x168] sm:$0xf0]  ;;  %v2613_v5 = vld [vmem:[#allocation5 + $0x1e4] sm:$0xf]  ;;  %v116_v9 = vld [vmem:[%s3201_s1 + $0x68] sm:$0xff] }
  0x4b   :  { %1039 = vmatpush.bf16.msra.mxu3 %v2200_v40  ;;  %1055 = vmatpush.bf16.msrb.mxu0 %v2248_v58  ;;  %v2224_v40 = vor.u32 %v2652_v24, %v2223_v23  ;;  %v2012_v50 = vor.u32 %v2597_v35, %v2009_v36  ;;  %v2583_v58 = vld [vmem:[#allocation5 + $0xf4] sm:$0xf]  ;;  %v2565_v14 = vld [vmem:[#allocation5 + $0x64] sm:$0xf]  ;;  %v1945_v19 = vld [vmem:[#allocation5 + $0xe8] sm:$0xf0] }
  0x4c   :  { %1071 = vmatpush.bf16.msrb.mxu1 %v2296_v59  ;;  %v1953_v59 = vld [vmem:[#allocation5 + $0xf8] sm:$0xf0]  ;;  %v2581_v18 = vld [vmem:[#allocation5 + $0xe4] sm:$0xf]  ;;  %v2611_v23 = vld [vmem:[#allocation5 + $0x1d4] sm:$0xf] }
  0x4d   :  { %v1956_v13 = vor.u32 %v2583_v58, %v1953_v59  ;;  %v2065_v24 = vld [vmem:[#allocation5 + $0x1d8] sm:$0xf0]  ;;  %v2591_v26 = vld [vmem:[#allocation5 + $0x134] sm:$0xf]  ;;  %v1948_v30 = vor.u32 %v2581_v18, %v1945_v19  ;;  %v2609_v39 = vld [vmem:[#allocation5 + $0x1c4] sm:$0xf] }
  0x4e   :  { %1026 = vmatpush.bf16.msra.mxu2 %v2128_v49  ;;  %v2567_v49 = vld [vmem:[#allocation5 + $0x74] sm:$0xf]  ;;  %v1937_v35 = vld [vmem:[#allocation5 + $0xd8] sm:$0xf0]  ;;  %v2068_v36 = vor.u32 %v2611_v23, %v2065_v24  ;;  %v2589_v43 = vld [vmem:[#allocation5 + $0x124] sm:$0xf] }
  0x4f   :  { %1040 = vmatpush.bf16.msra.mxu3 %v2192_v53  ;;  %1056 = vmatpush.bf16.msrb.mxu0 %v2240_v6  ;;  %v2081_v53 = vld [vmem:[#allocation5 + $0x1f8] sm:$0xf0]  ;;  %v2073_v6 = vld [vmem:[#allocation5 + $0x1e8] sm:$0xf0]  ;;  %v1892_v8 = vor.u32 %v2567_v49, %v1889_v55  ;;  %v2563_v31 = vld [vmem:[#allocation5 + $0x54] sm:$0xf] }
  0x50   :  { %1072 = vmatpush.bf16.msrb.mxu1 %v2288_v7  ;;  %v2084_v63 = vor.u32 %v2615_v52, %v2081_v53  ;;  %v2152_v7 = vor.u32 %v2634_v48, %v2151_v47  ;;  %v2076_v20 = vor.u32 %v2613_v5, %v2073_v6  ;;  %v2579_v34 = vld [vmem:[#allocation5 + $0xd4] sm:$0xf]  ;;  %v1977_v44 = vld [vmem:[#allocation5 + $0x128] sm:$0xf0]  ;;  %v2577_v48 = vld [vmem:[#allocation5 + $0xc4] sm:$0xf] }
  0x51   :  { %v1940_v45 = vor.u32 %v2579_v34, %v1937_v35  ;;  %v1865_v47 = vld [vmem:[#allocation5 + $0x48] sm:$0xf0]  ;;  %v1980_v52 = vor.u32 %v2589_v43, %v1977_v44  ;;  %v2607_v53 = vld [vmem:[#allocation5 + $0x1b4] sm:$0xf]  ;;  %v1969_v57 = vld [vmem:[#allocation5 + $0x118] sm:$0xf0] }
  0x52   :  { %1027 = vmatpush.bf16.msra.mxu2 %v2120_v62  ;;  %v115_v62 = vld [vmem:[%s3201_s1 + $0x60] sm:$0xff]  ;;  %v1929_v49 = vld [vmem:[#allocation5 + $0xc8] sm:$0xf0]  ;;  %v2585_v5 = vld [vmem:[#allocation5 + $0x104] sm:$0xf] }
  0x53   :  { %1041 = vmatpush.bf16.msra.mxu3 %v2184_v1  ;;  %1057 = vmatpush.bf16.msrb.mxu0 %v2232_v21  ;;  %v117_v1 = vld [vmem:[%s3201_s1 + $0x70] sm:$0xff]  ;;  %v3103_v17 = vpack.c.bf16 %v115_v62, %v107_v60  ;;  %v3105_v21 = vpack.c.bf16 %v116_v9, %v108_v3  ;;  %v2587_v56 = vld [vmem:[#allocation5 + $0x114] sm:$0xf]  ;;  %v1932_v58 = vor.u32 %v2577_v48, %v1929_v49  ;;  %v1857_v60 = vld [vmem:[#allocation5 + $0x38] sm:$0xf0] }
  0x54   :  { %1073 = vmatpush.bf16.msrb.mxu1 %v2280_v22  ;;  %v3101_v16 = vpack.c.bf16 %v117_v1, %v109_v0  ;;  %v2559_v59 = vld [vmem:[#allocation5 + $0x34] sm:$0xf]  ;;  %v1921_v62 = vld [vmem:[#allocation5 + $0xb8] sm:$0xf0]  ;;  %v1972_v0 = vor.u32 %v2587_v56, %v1969_v57  ;;  %v2605_v1 = vld [vmem:[#allocation5 + $0x1a4] sm:$0xf] }
  0x55   :  { %v1860_v3 = vor.u32 %v2559_v59, %v1857_v60  ;;  %v1961_v6 = vld [vmem:[#allocation5 + $0x108] sm:$0xf0]  ;;  %v2663_v9 = vld [vmem:[#allocation5 + $0x374] sm:$0xf]  ;;  %v2033_v19 = vld [vmem:[#allocation5 + $0x198] sm:$0xf0] }
  0x56   :  { %1028 = vmatpush.bf16.msra.mxu2 %v2112_v11  ;;  %v2593_v11 = vld [vmem:[#allocation5 + $0x144] sm:$0xf]  ;;  %v2603_v18 = vld [vmem:[#allocation5 + $0x194] sm:$0xf]  ;;  %v2145_v49 = vld [vmem:[#allocation5 + $0x278] sm:$0xf0] }
  0x57   :  { %1042 = vmatpush.bf16.msra.mxu3 %v2176_v15  ;;  %1058 = vmatpush.bf16.msrb.mxu0 %v2224_v40  ;;  %v1881_v15 = vld [vmem:[#allocation5 + $0x68] sm:$0xf0]  ;;  %v1996_v22 = vor.u32 %v2593_v11, %v1993_v12  ;;  %v2273_v11 = vld [vmem:[#allocation5 + $0x378] sm:$0xf0]  ;;  %v2573_v12 = vld [vmem:[#allocation5 + $0xa4] sm:$0xf]  ;;  %v2036_v34 = vor.u32 %v2603_v18, %v2033_v19 }
  0x58   :  { %1108 = vmatpush.bf16.msra.mxu1 %v2020_v29  ;;  %v1985_v29 = vld [vmem:[#allocation5 + $0x138] sm:$0xf0]  ;;  %v2057_v40 = vld [vmem:[#allocation5 + $0x1c8] sm:$0xf0]  ;;  %v2555_v23 = vld [vmem:[#allocation5 + $0x14] sm:$0xf]  ;;  %v2276_v24 = vor.u32 %v2663_v9, %v2273_v11 }
  0x59   :  { %2325 = vmatmul.msk.bf16.vlgmr.msrb.gmra.mxu1 %vm957_vm2, %v3079_v41  ;;  %v1988_v38 = vor.u32 %v2591_v26, %v1985_v29  ;;  %v1841_v26 = vld [vmem:[#allocation5 + $0x18] sm:$0xf0]  ;;  %v2661_v29 = vld [vmem:[#allocation5 + $0x364] sm:$0xf]  ;;  %v2631_v48 = vld [vmem:[#allocation5 + $0x274] sm:$0xf] }
  0x5a   :  { %1029 = vmatpush.bf16.msra.mxu2 %v2104_v25  ;;  %v1884_v25 = vor.u32 %v2565_v14, %v1881_v15  ;;  %v1964_v15 = vor.u32 %v2585_v5, %v1961_v6  ;;  %v2601_v35 = vld [vmem:[#allocation5 + $0x184] sm:$0xf]  ;;  %v2675_v57 = vld [vmem:[#allocation5 + $0x3d4] sm:$0xf]  ;;  %v2148_v60 = vor.u32 %v2631_v48, %v2145_v49  ;;  %v2313_v6 = vld [vmem:[#allocation5 + $0x3c8] sm:$0xf0] }
  0x5b   :  { %1043 = vmatpush.bf16.msra.mxu3 %v2168_v33  ;;  %1059 = vmatpush.bf16.msrb.mxu0 %v2216_v61  ;;  %v1873_v33 = vld [vmem:[#allocation5 + $0x58] sm:$0xf0]  ;;  %v2575_v61 = vld [vmem:[#allocation5 + $0xb4] sm:$0xf]  ;;  %v2569_v44 = vld [vmem:[#allocation5 + $0x84] sm:$0xf] }
  0x5c   :  { %1109 = vmatpush.bf16.msra.mxu1 %v2012_v50  ;;  %v1876_v42 = vor.u32 %v2563_v31, %v1873_v33  ;;  %v2060_v50 = vor.u32 %v2609_v39, %v2057_v40  ;;  %v2571_v31 = vld [vmem:[#allocation5 + $0x94] sm:$0xf]  ;;  %v1905_v33 = vld [vmem:[#allocation5 + $0x98] sm:$0xf0]  ;;  %v1844_v39 = vor.u32 %v2555_v23, %v1841_v26  ;;  %v1833_v40 = vld [vmem:[#allocation5 + $0x8] sm:$0xf0] }
  0x5d   :  { %v1908_v43 = vor.u32 %v2571_v31, %v1905_v33  ;;  %v2673_v5 = vld [vmem:[#allocation5 + $0x3c4] sm:$0xf]  ;;  %v2241_v9 = vld [vmem:[#allocation5 + $0x338] sm:$0xf0] }
  0x5e   :  { %1030 = vmatpush.bf16.msra.mxu2 %v2096_v46  ;;  %1060 = vmatmul.bf16.vlgmr.msrb.gmra.mxu0 %v3101_v16  ;;  %v2561_v46 = vld [vmem:[#allocation5 + $0x44] sm:$0xf]  ;;  %v2316_v18 = vor.u32 %v2673_v5, %v2313_v6  ;;  %v2089_v6 = vld [vmem:[#allocation5 + $0x208] sm:$0xf0] }
  0x5f   :  { %1044 = vmatpush.bf16.msra.mxu3 %v2160_v54  ;;  %1122 = vmatpush.bf16.msra.mxu0 %v2084_v63  ;;  %v2049_v54 = vld [vmem:[#allocation5 + $0x1b8] sm:$0xf0]  ;;  %v1868_v55 = vor.u32 %v2561_v46, %v1865_v47  ;;  %v1897_v47 = vld [vmem:[#allocation5 + $0x88] sm:$0xf0]  ;;  %v2649_v49 = vld [vmem:[#allocation5 + $0x304] sm:$0xf] }
  0x60   :  { %1110 = vmatpush.bf16.msra.mxu1 %v2004_v4  ;;  %v2052_v63 = vor.u32 %v2607_v53, %v2049_v54  ;;  %v2557_v4 = vld [vmem:[#allocation5 + $0x24] sm:$0xf]  ;;  %v2257_v46 = vld [vmem:[#allocation5 + $0x358] sm:$0xf0]  ;;  %v1900_v59 = vor.u32 %v2569_v44, %v1897_v47 }
  0x61   :  { %v2209_v53 = vld [vmem:[#allocation5 + $0x2f8] sm:$0xf0]  ;;  %v2617_v5 = vld [vmem:[#allocation5 + $0x204] sm:$0xf] }
  0x62   :  { %1031 = vmatpush.bf16.msra.mxu2 %v2088_v2  ;;  %v2041_v2 = vld [vmem:[#allocation5 + $0x1a8] sm:$0xf0]  ;;  %v2289_v47 = vld [vmem:[#allocation5 + $0x398] sm:$0xf0] }
  0x63   :  { %1045 = vmatpush.bf16.msra.mxu3 %v2152_v7  ;;  %1123 = vmatpush.bf16.msra.mxu0 %v2076_v20  ;;  %v1924_v7 = vor.u32 %v2575_v61, %v1921_v62  ;;  %v2044_v14 = vor.u32 %v2605_v1, %v2041_v2  ;;  %v706_v20 = vunpack.c.h.b16 %v3033_v37  ;;  %v2553_v37 = vld [vmem:[#allocation5 + $0x4] sm:$0xf]  ;;  %v2249_v62 = vld [vmem:[#allocation5 + $0x348] sm:$0xf0] }
  0x64   :  { %1111 = vmatpush.bf16.msra.mxu1 %v1996_v22  ;;  %v2657_v61 = vld [vmem:[#allocation5 + $0x344] sm:$0xf]  ;;  %v2137_v1 = vld [vmem:[#allocation5 + $0x268] sm:$0xf0] }
  0x65   :  { %1032 = vmatmul.bf16.vlgmr.msra.gmra.mxu2 %v3103_v17  ;;  %v2201_v2 = vld [vmem:[#allocation5 + $0x2e8] sm:$0xf0] }
  0x66   :  { %1080 = vmatpush.bf16.msrb.mxu2 %v1892_v8  ;;  %1046 = vmatmul.bf16.vlgmr.msra.gmra.mxu3 %v3105_v21  ;;  %v1849_v8 = vld [vmem:[#allocation5 + $0x28] sm:$0xf0] }
  0x67   :  { %1094 = vmatpush.bf16.msrb.mxu3 %v1956_v13  ;;  %1124 = vmatpush.bf16.msra.mxu0 %v2068_v36  ;;  %v1913_v13 = vld [vmem:[#allocation5 + $0xa8] sm:$0xf0]  ;;  %v1852_v22 = vor.u32 %v2557_v4, %v1849_v8  ;;  %v2252_v4 = vor.u32 %v2657_v61, %v2249_v62  ;;  %v2655_v8 = vld [vmem:[#allocation5 + $0x334] sm:$0xf] }
  0x68   :  { %1112 = vmatpush.bf16.msra.mxu1 %v1988_v38  ;;  %v2025_v36 = vld [vmem:[#allocation5 + $0x188] sm:$0xf0]  ;;  %v832_v38 = vpack.c.b16 %v706_v20, %v706_v20  ;;  %v2244_v19 = vor.u32 %v2655_v8, %v2241_v9  ;;  %v2671_v20 = vld [vmem:[#allocation5 + $0x3b4] sm:$0xf]  ;;  %v2092_v9 = vor.u32 %v2617_v5, %v2089_v6 }
  0x69   :  { %v2153_v8 = vld [vmem:[#allocation5 + $0x288] sm:$0xf0] }
  0x6a   :  { %1081 = vmatpush.bf16.msrb.mxu2 %v1884_v25  ;;  %v1916_v25 = vor.u32 %v2573_v12, %v1913_v13  ;;  %v966_v54 = vsel %vm961_vm1, %v832_v38, 0  ;;  %v2627_v12 = vld [vmem:[#allocation5 + $0x254] sm:$0xf]  ;;  %v2129_v13 = vld [vmem:[#allocation5 + $0x258] sm:$0xf0] }
  0x6b   :  { %1095 = vmatpush.bf16.msrb.mxu3 %v1948_v30  ;;  %1125 = vmatpush.bf16.msra.mxu0 %v2060_v50  ;;  %v2265_v30 = vld [vmem:[#allocation5 + $0x368] sm:$0xf0]  ;;  %v2028_v50 = vor.u32 %v2601_v35, %v2025_v36  ;;  %v2132_v23 = vor.u32 %v2627_v12, %v2129_v13  ;;  %v2651_v36 = vld [vmem:[#allocation5 + $0x314] sm:$0xf]  ;;  %v2225_v38 = vld [vmem:[#allocation5 + $0x318] sm:$0xf0] }
  0x6c   :  { %1113 = vmatpush.bf16.msra.mxu1 %v1980_v52  ;;  %v2647_v52 = vld [vmem:[#allocation5 + $0x2f4] sm:$0xf] }
  0x6e   :  { %1082 = vmatpush.bf16.msrb.mxu2 %v1876_v42  ;;  %v2268_v42 = vor.u32 %v2661_v29, %v2265_v30  ;;  %v2625_v29 = vld [vmem:[#allocation5 + $0x244] sm:$0xf] }
  0x6f   :  { %1096 = vmatpush.bf16.msrb.mxu3 %v1940_v45  ;;  %1126 = vmatpush.bf16.msra.mxu0 %v2052_v63  ;;  %v2659_v45 = vld [vmem:[#allocation5 + $0x354] sm:$0xf]  ;;  %v2212_v63 = vor.u32 %v2647_v52, %v2209_v53  ;;  %v2641_v30 = vld [vmem:[#allocation5 + $0x2c4] sm:$0xf] }
  0x70   :  { %1114 = vmatpush.bf16.msra.mxu1 %v1972_v0  ;;  %v2260_v56 = vor.u32 %v2659_v45, %v2257_v46  ;;  %v2629_v0 = vld [vmem:[#allocation5 + $0x264] sm:$0xf]  ;;  %v2228_v45 = vor.u32 %v2651_v36, %v2225_v38  ;;  %v2667_v46 = vld [vmem:[#allocation5 + $0x394] sm:$0xf] }
  0x71   :  { %v2621_v53 = vld [vmem:[#allocation5 + $0x224] sm:$0xf] }
  0x72   :  { %1083 = vmatpush.bf16.msrb.mxu2 %v1868_v55  ;;  %v1836_v55 = vor.u32 %v2553_v37, %v1833_v40  ;;  %v2623_v37 = vld [vmem:[#allocation5 + $0x234] sm:$0xf]  ;;  %v2113_v40 = vld [vmem:[#allocation5 + $0x238] sm:$0xf0] }
  0x73   :  { %1097 = vmatpush.bf16.msrb.mxu3 %v1932_v58  ;;  %1127 = vmatpush.bf16.msra.mxu0 %v2044_v14  ;;  %v2321_v58 = vld [vmem:[#allocation5 + $0x3d8] sm:$0xf0]  ;;  %v2643_v14 = vld [vmem:[#allocation5 + $0x2d4] sm:$0xf]  ;;  %v2116_v48 = vor.u32 %v2623_v37, %v2113_v40  ;;  %v2702_v37 = vld [vmem:[#allocation8 + $0x44] sm:$0xf0] }
  0x74   :  { %1115 = vmatpush.bf16.msra.mxu1 %v1964_v15  ;;  %v2193_v15 = vld [vmem:[#allocation5 + $0x2d8] sm:$0xf0]  ;;  %v2701_v40 = vld [vmem:[#allocation8 + $0x44] sm:$0xf] }
  0x75   :  { %v2196_v26 = vor.u32 %v2643_v14, %v2193_v15 }
  0x76   :  { %1084 = vmatpush.bf16.msrb.mxu2 %v1860_v3  ;;  %v2324_v3 = vor.u32 %v2675_v57, %v2321_v58  ;;  %v2292_v57 = vor.u32 %v2667_v46, %v2289_v47 }
  0x77   :  { %1098 = vmatpush.bf16.msrb.mxu3 %v1924_v7  ;;  %1128 = vmatpush.bf16.msra.mxu0 %v2036_v34  ;;  %v2140_v7 = vor.u32 %v2629_v0, %v2137_v1  ;;  %v2669_v34 = vld [vmem:[#allocation5 + $0x3a4] sm:$0xf]  ;;  %v2097_v0 = vld [vmem:[#allocation5 + $0x218] sm:$0xf0]  ;;  %v2635_v1 = vld [vmem:[#allocation5 + $0x294] sm:$0xf] }
  0x78   :  { %1164 = vmatpush.bf16.msrb.mxu1 %v2276_v24  ;;  %v2653_v24 = vld [vmem:[#allocation5 + $0x324] sm:$0xf] }
  0x79   :  { %1116 = vmatmul.bf16.vlgmr.msra.gmra.mxu1 %v3063_v27  ;;  %v2645_v27 = vld [vmem:[#allocation5 + $0x2e4] sm:$0xf] }
  0x7a   :  { %1085 = vmatpush.bf16.msrb.mxu2 %v1852_v22  ;;  %v2204_v11 = vor.u32 %v2645_v27, %v2201_v2  ;;  %v2305_v22 = vld [vmem:[#allocation5 + $0x3b8] sm:$0xf0] }
  0x7b   :  { %1099 = vmatpush.bf16.msrb.mxu3 %v1916_v25  ;;  %1129 = vmatpush.bf16.msra.mxu0 %v2028_v50  ;;  %v2233_v25 = vld [vmem:[#allocation5 + $0x328] sm:$0xf0]  ;;  %v2308_v31 = vor.u32 %v2671_v20, %v2305_v22  ;;  %v2161_v27 = vld [vmem:[#allocation5 + $0x298] sm:$0xf0]  ;;  %v2387_v22 = vld [vmem:[#allocation8 + $0x78] sm:$0xf0] }
  0x7c   :  { %1165 = vmatpush.bf16.msrb.mxu1 %v2268_v42  ;;  %v2236_v33 = vor.u32 %v2653_v24, %v2233_v25  ;;  %v2639_v42 = vld [vmem:[#allocation5 + $0x2b4] sm:$0xf]  ;;  %v2217_v50 = vld [vmem:[#allocation5 + $0x308] sm:$0xf0]  ;;  %v2706_v24 = vld [vmem:[#allocation8 + $0x64] sm:$0xf0] }
  0x7d   :  { %v2220_v58 = vor.u32 %v2649_v49, %v2217_v50  ;;  %v2705_v25 = vld [vmem:[#allocation8 + $0x64] sm:$0xf]  ;;  %v2353_v49 = vld [vmem:[#allocation8 + $0x30] sm:$0xf]  ;;  %v2700_v50 = vld [vmem:[#allocation8 + $0x34] sm:$0xf0] }
  0x7e   :  { %1086 = vmatpush.bf16.msrb.mxu2 %v1844_v39  ;;  %1130 = vmatmul.bf16.vlgmr.msra.gmra.mxu0 %v3046_v10  ;;  %v2121_v10 = vld [vmem:[#allocation5 + $0x248] sm:$0xf0] }
  0x7f   :  { %1100 = vmatpush.bf16.msrb.mxu3 %v1908_v43  ;;  %1179 = vmatpush.bf16.msrb.mxu0 %v966_v54  ;;  %v2124_v35 = vor.u32 %v2625_v29, %v2121_v10  ;;  %v2177_v43 = vld [vmem:[#allocation5 + $0x2b8] sm:$0xf0]  ;;  %v2105_v54 = vld [vmem:[#allocation5 + $0x228] sm:$0xf0]  ;;  %v2379_v29 = vld [vmem:[#allocation8 + $0x68] sm:$0xf0] }
  0x80   :  { %1166 = vmatpush.bf16.msrb.mxu1 %v2260_v56  ;;  %v2180_v52 = vor.u32 %v2639_v42, %v2177_v43  ;;  %v2169_v56 = vld [vmem:[#allocation5 + $0x2a8] sm:$0xf0]  ;;  %v2108_v61 = vor.u32 %v2621_v53, %v2105_v54  ;;  %v2363_v43 = vld [vmem:[#allocation8 + $0x48] sm:$0xf0]  ;;  %v2354_v54 = vor.u32 %v2700_v50, %v2353_v49 }
  0x82   :  { %1087 = vmatpush.bf16.msrb.mxu2 %v1836_v55  ;;  %v2637_v55 = vld [vmem:[#allocation5 + $0x2a4] sm:$0xf] }
  0x83   :  { %1101 = vmatpush.bf16.msrb.mxu3 %v1900_v59  ;;  %1180 = vmatpush.bf16.msrb.mxu0 %v2324_v3  ;;  %v2665_v59 = vld [vmem:[#allocation5 + $0x384] sm:$0xf]  ;;  %v2172_v62 = vor.u32 %v2637_v55, %v2169_v56 }
  0x84   :  { %1167 = vmatpush.bf16.msrb.mxu1 %v2252_v4  ;;  %v2164_v4 = vor.u32 %v2635_v1, %v2161_v27  ;;  %v2355_v55 = vld [vmem:[#allocation8 + $0x38] sm:$0xf0] }
  0x85   :  { %1088 = vmatmul.bf16.vlgmr.msrb.gmra.mxu2 %v3066_v28  ;;  %v2185_v28 = vld [vmem:[#allocation5 + $0x2c8] sm:$0xf0] }
  0x86   :  { %1136 = vmatpush.bf16.msra.mxu2 %v2148_v60  ;;  %1102 = vmatmul.bf16.vlgmr.msrb.gmra.mxu3 %v3068_v32  ;;  %v2297_v32 = vld [vmem:[#allocation5 + $0x3a8] sm:$0xf0]  ;;  %v2188_v39 = vor.u32 %v2641_v30, %v2185_v28  ;;  %v2382_v30 = vor.u32 %v2705_v25, %v2379_v29 }
  0x87   :  { %1150 = vmatpush.bf16.msra.mxu3 %v2212_v63  ;;  %1181 = vmatpush.bf16.msrb.mxu0 %v2316_v18  ;;  %v2300_v44 = vor.u32 %v2669_v34, %v2297_v32  ;;  %v2281_v60 = vld [vmem:[#allocation5 + $0x388] sm:$0xf0]  ;;  %v2619_v63 = vld [vmem:[#allocation5 + $0x214] sm:$0xf]  ;;  %v2708_v18 = vld [vmem:[#allocation8 + $0x74] sm:$0xf0] }
  0x88   :  { %1168 = vmatpush.bf16.msrb.mxu1 %v2244_v19  ;;  %v2284_v2 = vor.u32 %v2665_v59, %v2281_v60  ;;  %v2100_v3 = vor.u32 %v2619_v63, %v2097_v0  ;;  %v2707_v19 = vld [vmem:[#allocation8 + $0x74] sm:$0xf]  ;;  %v2345_v59 = vld [vmem:[#allocation8 + $0x20] sm:$0xf]  ;;  %v2698_v60 = vld [vmem:[#allocation8 + $0x24] sm:$0xf0] }
  0x89   :  { %v2703_v34 = vld [vmem:[#allocation8 + $0x54] sm:$0xf]  ;;  %v2347_v63 = vld [vmem:[#allocation8 + $0x28] sm:$0xf0] }
  0x8a   :  { %1137 = vmatpush.bf16.msra.mxu2 %v2140_v7  ;;  %v2633_v7 = vld [vmem:[#allocation5 + $0x284] sm:$0xf] }
  0x8b   :  { %1151 = vmatpush.bf16.msra.mxu3 %v2204_v11  ;;  %1182 = vmatpush.bf16.msrb.mxu0 %v2308_v31  ;;  %v2156_v11 = vor.u32 %v2633_v7, %v2153_v8  ;;  %v2369_v31 = vld [vmem:[#allocation8 + $0x50] sm:$0xf]  ;;  %v2696_v8 = vld [vmem:[#allocation8 + $0x14] sm:$0xf0] }
  0x8c   :  { %1169 = vmatpush.bf16.msrb.mxu1 %v2236_v33  ;;  %v2704_v33 = vld [vmem:[#allocation8 + $0x54] sm:$0xf0]  ;;  %v2337_v7 = vld [vmem:[#allocation8 + $0x10] sm:$0xf] }
  0x8d   :  { %v2370_v32 = vor.u32 %v2704_v33, %v2369_v31 }
  0x8e   :  { %1138 = vmatpush.bf16.msra.mxu2 %v2132_v23  ;;  %v2390_v23 = vor.u32 %v2707_v19, %v2387_v22 }
  0x8f   :  { %1152 = vmatpush.bf16.msra.mxu3 %v2196_v26  ;;  %1183 = vmatpush.bf16.msrb.mxu0 %v2300_v44 }
  0x90   :  { %1170 = vmatpush.bf16.msrb.mxu1 %v2228_v45  ;;  %v2366_v45 = vor.u32 %v2701_v40, %v2363_v43 }
  0x92   :  { %1139 = vmatpush.bf16.msra.mxu2 %v2124_v35  ;;  %v2371_v35 = vld [vmem:[#allocation8 + $0x58] sm:$0xf0] }
  0x93   :  { %1153 = vmatpush.bf16.msra.mxu3 %v2188_v39  ;;  %1184 = vmatpush.bf16.msrb.mxu0 %v2292_v57  ;;  %v2374_v38 = vor.u32 %v2703_v34, %v2371_v35  ;;  %v2361_v39 = vld [vmem:[#allocation8 + $0x40] sm:$0xf] }
  0x94   :  { %1171 = vmatpush.bf16.msrb.mxu1 %v2220_v58  ;;  %v2362_v42 = vor.u32 %v2702_v37, %v2361_v39 }
  0x96   :  { %1140 = vmatpush.bf16.msra.mxu2 %v2116_v48 }
  0x97   :  { %1154 = vmatpush.bf16.msra.mxu3 %v2180_v52  ;;  %1185 = vmatpush.bf16.msrb.mxu0 %v2284_v2  ;;  %v2699_v52 = vld [vmem:[#allocation8 + $0x34] sm:$0xf] }
  0x98   :  { %1172 = vmatmul.bf16.vlgmr.msrb.gmra.mxu1 %v3101_v16  ;;  %v2385_v16 = vld [vmem:[#allocation8 + $0x70] sm:$0xf]  ;;  %v2358_v58 = vor.u32 %v2699_v52, %v2355_v55  ;;  %v2723_v55 = vld [vmem:[#allocation8 + $0xf4] sm:$0xf] }
  0x99   :  { %v2386_v20 = vor.u32 %v2708_v18, %v2385_v16 }
  0x9a   :  { %1141 = vmatpush.bf16.msra.mxu2 %v2108_v61  ;;  %2326 = vmatmul.msk.bf16.vlgmr.msrb.gmra.mxu0 %vm957_vm2, %v3079_v41  ;;  %v2377_v41 = vld [vmem:[#allocation8 + $0x60] sm:$0xf]  ;;  %v2697_v61 = vld [vmem:[#allocation8 + $0x24] sm:$0xf] }
  0x9b   :  { %1155 = vmatpush.bf16.msra.mxu3 %v2172_v62  ;;  %1468 = vmatpush.bf16.msra.mxu0 %v2390_v23  ;;  %v2346_v62 = vor.u32 %v2698_v60, %v2345_v59  ;;  %v2350_v27 = vor.u32 %v2697_v61, %v2347_v63  ;;  %v2329_v23 = vld [vmem:[#allocation8] sm:$0xf]  ;;  %v2451_v60 = vld [vmem:[#allocation8 + $0xf8] sm:$0xf0] }
  0x9c   :  { %v2454_v61 = vor.u32 %v2723_v55, %v2451_v60  ;;  %v2712_v55 = vld [vmem:[#allocation8 + $0x94] sm:$0xf0] }
  0x9e   :  { %1142 = vmatpush.bf16.msra.mxu2 %v2100_v3  ;;  %1482 = vmatpush.bf16.msra.mxu1 %v2454_v61 }
  0x9f   :  { %1156 = vmatpush.bf16.msra.mxu3 %v2164_v4  ;;  %1469 = vmatpush.bf16.msra.mxu0 %v2382_v30  ;;  %v3128_v4 = vld [vmem:[%s3205_s5] sm:$0x3] }
  0xa2   :  { %1143 = vmatpush.bf16.msra.mxu2 %v2092_v9  ;;  %v2695_v9 = vld [vmem:[#allocation8 + $0x14] sm:$0xf] }
  0xa3   :  { %1157 = vmatpush.bf16.msra.mxu3 %v2156_v11  ;;  %1470 = vmatpush.bf16.msra.mxu0 %v2374_v38 }
  0xa5   :  { %1144 = vmatmul.bf16.vlgmr.msra.gmra.mxu2 %v3103_v17 }
  0xa6   :  { %1158 = vmatmul.bf16.vlgmr.msra.gmra.mxu3 %v3105_v21  ;;  %1440 = vmatpush.bf16.msrb.mxu2 %v2386_v20  ;;  %v2378_v21 = vor.u32 %v2706_v24, %v2377_v41  ;;  %v1194_v20 = vperm.slane %v3128_v4, 0  ;;  %v2694_v41 = vld [vmem:[#allocation8 + $0x4] sm:$0xf0]  ;;  %v2693_v24 = vld [vmem:[#allocation8 + $0x4] sm:$0xf] }
  0xa7   :  { %1471 = vmatpush.bf16.msra.mxu0 %v2366_v45  ;;  %v2330_v25 = vor.u32 %v2694_v41, %v2329_v23  ;;  %v2425_v23 = vld [vmem:[#allocation8 + $0xc0] sm:$0xf]  ;;  %v2718_v41 = vld [vmem:[#allocation8 + $0xc4] sm:$0xf0] }
  0xa8   :  { %v313_v12 = vpop.f32.mrf.mxu2 }
  0xa9   :  { %v3121_v13 = vpop.f32.mrf.mxu3 }
  0xaa   :  { %1441 = vmatpush.bf16.msrb.mxu2 %v2378_v21 }
  0xab   :  { %1472 = vmatpush.bf16.msra.mxu0 %v2358_v58 }
  0xae   :  { %1442 = vmatpush.bf16.msrb.mxu2 %v2370_v32 }
  0xaf   :  { %1473 = vmatpush.bf16.msra.mxu0 %v2350_v27  ;;  %v2721_v27 = vld [vmem:[#allocation8 + $0xe4] sm:$0xf] }
  0xb0   :  { %v315_v14 = vpop.f32.mrf.mxu2 }
  0xb1   :  { %v3123_v15 = vpop.f32.mrf.mxu3 }
  0xb2   :  { %1443 = vmatpush.bf16.msrb.mxu2 %v2362_v42 }
  0xb6   :  { %1444 = vmatpush.bf16.msrb.mxu2 %v2354_v54  ;;  %v2724_v54 = vld [vmem:[#allocation8 + $0xf4] sm:$0xf0] }
  0xba   :  { %v1019_v28 = vpop.f32.mrf.mxu1  ;;  %1445 = vmatpush.bf16.msrb.mxu2 %v2346_v62 }
  0xbb   :  { %v1005_v26 = vpop.f32.mrf.mxu0 }
  0xc2   :  { %v1021_v53 = vpop.f32.mrf.mxu1 }
  0xc3   :  { %v1007_v47 = vpop.f32.mrf.mxu0 }
  0xc8   :  { %v977_v17 = vpop.f32.mrf.mxu2 }
  0xc9   :  { %v991_v10 = vpop.f32.mrf.mxu3  ;;  %v978_v36 = vadd.f32 %v977_v17, %v313_v12  ;;  %v2338_v12 = vor.u32 %v2696_v8, %v2337_v7  ;;  %v2331_v17 = vld [vmem:[#allocation8 + $0x8] sm:$0xf0] }
  0xca   :  { %v2334_v29 = vor.u32 %v2693_v24, %v2331_v17  ;;  %v2717_v24 = vld [vmem:[#allocation8 + $0xc4] sm:$0xf]  ;;  %v2427_v17 = vld [vmem:[#allocation8 + $0xc8] sm:$0xf0] }
  0xcb   :  { %v992_v44 = vadd.f32 %v991_v10, %v978_v36  ;;  %1446 = vmatpush.bf16.msrb.mxu2 %v2338_v12  ;;  %v2720_v12 = vld [vmem:[#allocation8 + $0xd4] sm:$0xf0] }
  0xcd   :  { %v1006_v56 = vadd.f32 %v1005_v26, %v992_v44 }
  0xcf   :  { %v1020_v0 = vadd.f32 %v1019_v28, %v1006_v56  ;;  %1447 = vmatpush.bf16.msrb.mxu2 %v2330_v25  ;;  %v2426_v25 = vor.u32 %v2718_v41, %v2425_v23 }
  0xd0   :  { %v979_v46 = vpop.f32.mrf.mxu2 }
  0xd1   :  { %v993_v48 = vpop.f32.mrf.mxu3  ;;  %v980_v57 = vadd.f32 %v979_v46, %v315_v14  ;;  %v2339_v14 = vld [vmem:[#allocation8 + $0x18] sm:$0xf0] }
  0xd2   :  { %v2342_v19 = vor.u32 %v2695_v9, %v2339_v14  ;;  %v2719_v14 = vld [vmem:[#allocation8 + $0xd4] sm:$0xf] }
  0xd3   :  { %v994_v1 = vadd.f32 %v993_v48, %v980_v57 }
  0xd4   :  { %1474 = vmatpush.bf16.msra.mxu0 %v2342_v19  ;;  %v2435_v19 = vld [vmem:[#allocation8 + $0xd8] sm:$0xf0] }
  0xd5   :  { %v1008_v16 = vadd.f32 %v1007_v47, %v994_v1  ;;  %v2722_v1 = vld [vmem:[#allocation8 + $0xe4] sm:$0xf0] }
  0xd6   :  { %v1075_v11 = vpop.f32.mrf.mxu1 }
  0xd7   :  { %v1022_v26 = vadd.f32 %v1021_v53, %v1008_v16  ;;  %v2449_v53 = vld [vmem:[#allocation8 + $0xf0] sm:$0xf] }
  0xd8   :  { %1475 = vmatpush.bf16.msra.mxu0 %v2334_v29  ;;  %v2450_v59 = vor.u32 %v2724_v54, %v2449_v53  ;;  %v2417_v29 = vld [vmem:[#allocation8 + $0xb0] sm:$0xf] }
  0xd9   :  { %v2401_v54 = vld [vmem:[#allocation8 + $0x90] sm:$0xf] }
  0xda   :  { %1454 = vmatpush.bf16.msrb.mxu3 %v2450_v59 }
  0xdb   :  { %v1061_v3 = vpop.f32.mrf.mxu0 }
  0xde   :  { %v1077_v35 = vpop.f32.mrf.mxu1 }
  0xe3   :  { %v1063_v33 = vpop.f32.mrf.mxu0 }
  0xe8   :  { %v1033_v2 = vpop.f32.mrf.mxu2 }
  0xe9   :  { %v1034_v5 = vadd.f32 %v1033_v2, %v1020_v0  ;;  %v1047_v6 = vpop.f32.mrf.mxu3  ;;  %v2441_v0 = vld [vmem:[#allocation8 + $0xe0] sm:$0xf] }
  0xeb   :  { %v1048_v18 = vadd.f32 %v1047_v6, %v1034_v5  ;;  %v2442_v5 = vor.u32 %v2722_v1, %v2441_v0  ;;  %v2443_v6 = vld [vmem:[#allocation8 + $0xe8] sm:$0xf0]  ;;  %v2402_v1 = vor.u32 %v2712_v55, %v2401_v54 }
  0xec   :  { %v2446_v8 = vor.u32 %v2721_v27, %v2443_v6  ;;  %v2709_v6 = vld [vmem:[#allocation8 + $0x84] sm:$0xf] }
  0xed   :  { %v1062_v22 = vadd.f32 %v1061_v3, %v1048_v18  ;;  %1455 = vmatpush.bf16.msrb.mxu3 %v2442_v5  ;;  %v2710_v5 = vld [vmem:[#allocation8 + $0x84] sm:$0xf0] }
  0xee   :  { %1483 = vmatpush.bf16.msra.mxu1 %v2446_v8 }
  0xef   :  { %v1076_v21 = vadd.f32 %v1075_v11, %v1062_v22  ;;  %v2433_v11 = vld [vmem:[#allocation8 + $0xd0] sm:$0xf]  ;;  %v2438_v22 = vor.u32 %v2719_v14, %v2435_v19  ;;  %v1195_v14 = vperm.slane %v3128_v4, 1  ;;  %v2689_v4 = vld [vmem:[#allocation7 + $0x24] sm:$0xf] }
  0xf0   :  { %v1035_v10 = vpop.f32.mrf.mxu2  ;;  %v2434_v18 = vor.u32 %v2720_v12, %v2433_v11 }
  0xf1   :  { %v1198_v30 = vadd.f32 %v1194_v20, %v1076_v21  ;;  %v1036_v28 = vadd.f32 %v1035_v10, %v1022_v26  ;;  %v1049_v31 = vpop.f32.mrf.mxu3  ;;  %v2430_v21 = vor.u32 %v2717_v24, %v2427_v17  ;;  %v2716_v10 = vld [vmem:[#allocation8 + $0xb4] sm:$0xf0]  ;;  %v2483_v17 = vld [vmem:[#allocation7 + $0x38] sm:$0xf0] }
  0xf2   :  { %1456 = vmatpush.bf16.msrb.mxu3 %v2434_v18  ;;  %1484 = vmatpush.bf16.msra.mxu1 %v2438_v22 }
  0xf3   :  { %v1206_v34 = vmul.f32 %v1198_v30, %v1198_v30  ;;  %v1050_v32 = vadd.f32 %v1049_v31, %v1036_v28  ;;  %v1202_v56 = vmul.f32 0.5, %v1198_v30  ;;  %v2419_v31 = vld [vmem:[#allocation8 + $0xb8] sm:$0xf0] }
  0xf5   :  { %v1210_v36 = vmul.f32 %v1206_v34, %v1198_v30  ;;  %v1064_v38 = vadd.f32 %v1063_v33, %v1050_v32  ;;  %v2481_v33 = vld [vmem:[#allocation7 + $0x30] sm:$0xf]  ;;  %v2692_v34 = vld [vmem:[#allocation7 + $0x34] sm:$0xf0] }
  0xf6   :  { %v1117_v9 = vpop.f32.mrf.mxu1  ;;  %1457 = vmatpush.bf16.msrb.mxu3 %v2426_v25  ;;  %1485 = vmatpush.bf16.msra.mxu1 %v2430_v21  ;;  %v2691_v25 = vld [vmem:[#allocation7 + $0x34] sm:$0xf] }
  0xf7   :  { %v1214_v39 = vmul.f32 0.044715, %v1210_v36  ;;  %v1078_v37 = vadd.f32 %v1077_v35, %v1064_v38  ;;  %v2482_v36 = vor.u32 %v2692_v34, %v2481_v33  ;;  %v2409_v38 = vld [vmem:[#allocation8 + $0xa0] sm:$0xf]  ;;  %v2486_v21 = vor.u32 %v2691_v25, %v2483_v17 }
  0xf9   :  { %v1218_v40 = vadd.f32 %v1214_v39, %v1198_v30  ;;  %v1200_v42 = vadd.f32 %v1194_v20, %v1078_v37  ;;  %v2715_v30 = vld [vmem:[#allocation8 + $0xb4] sm:$0xf]  ;;  %v2714_v39 = vld [vmem:[#allocation8 + $0xa4] sm:$0xf0]  ;;  %v2713_v37 = vld [vmem:[#allocation8 + $0xa4] sm:$0xf]  ;;  %1540 = vmatpush.bf16.msra.mxu2 %v2482_v36 }
  0xfa   :  { %v2422_v35 = vor.u32 %v2715_v30, %v2419_v31 }
  0xfb   :  { %v1208_v43 = vmul.f32 %v1200_v42, %v1200_v42  ;;  %v1222_v44 = vmul.f32 0.7978846, %v1218_v40  ;;  %v1204_v57 = vmul.f32 0.5, %v1200_v42  ;;  %v1131_v16 = vpop.f32.mrf.mxu0 }
  0xfc   :  { %1486 = vmatpush.bf16.msra.mxu1 %v2422_v35 }
  0xfd   :  { %v1212_v45 = vmul.f32 %v1208_v43, %v1200_v42  ;;  %2749 = vtanh.f32 %v1222_v44  ;;  %v2473_v43 = vld [vmem:[#allocation7 + $0x20] sm:$0xf]  ;;  %v2690_v44 = vld [vmem:[#allocation7 + $0x24] sm:$0xf0] }
  0xfe   :  { %v1119_v40 = vpop.f32.mrf.mxu1 }
  0xff   :  { %v1216_v46 = vmul.f32 0.044715, %v1212_v45 }
 0x101   :  { %v1220_v47 = vadd.f32 %v1216_v46, %v1200_v42  ;;  %v2411_v42 = vld [vmem:[#allocation8 + $0xa8] sm:$0xf0] }
 0x102   :  { %v2414_v53 = vor.u32 %v2713_v37, %v2411_v42  ;;  %v2685_v42 = vld [vmem:[#allocation7 + $0x4] sm:$0xf] }
 0x103   :  { %v1224_v48 = vmul.f32 0.7978846, %v1220_v47  ;;  %v2750_v49 = vpop.eup %2749  ;;  %v2474_v47 = vor.u32 %v2690_v44, %v2473_v43  ;;  %v2459_v43 = vld [vmem:[#allocation7 + $0x8] sm:$0xf0] }
 0x104   :  { %v1230_v50 = vadd.f32 1.0, %v2750_v49  ;;  %v2465_v49 = vld [vmem:[#allocation7 + $0x10] sm:$0xf]  ;;  %1487 = vmatpush.bf16.msra.mxu1 %v2414_v53 }
 0x105   :  { %2751 = vtanh.f32 %v1224_v48  ;;  %v1133_v48 = vpop.f32.mrf.mxu0  ;;  %1541 = vmatpush.bf16.msra.mxu2 %v2474_v47 }
 0x106   :  { %v1234_v62 = vmul.f32 %v1230_v50, %v1202_v56  ;;  %v2688_v50 = vld [vmem:[#allocation7 + $0x14] sm:$0xf0]  ;;  %v2711_v56 = vld [vmem:[#allocation8 + $0x94] sm:$0xf] }
 0x107   :  { %v2466_v60 = vor.u32 %v2688_v50, %v2465_v49 }
 0x108   :  { %v1089_v2 = vpop.f32.mrf.mxu2 }
 0x109   :  { %v1103_v7 = vpop.f32.mrf.mxu3  ;;  %v1090_v20 = vadd.f32 %v1089_v2, %v3121_v13  ;;  %v2418_v13 = vor.u32 %v2716_v10, %v2417_v29  ;;  %v2393_v2 = vld [vmem:[#allocation8 + $0x80] sm:$0xf]  ;;  %1542 = vmatpush.bf16.msra.mxu2 %v2466_v60  ;;  %v2475_v29 = vld [vmem:[#allocation7 + $0x28] sm:$0xf0] }
 0x10a   :  { %v2394_v18 = vor.u32 %v2710_v5, %v2393_v2  ;;  %v2478_v31 = vor.u32 %v2689_v4, %v2475_v29  ;;  %v2739_v2 = vld [vmem:[%s3208_s8 + $0x70] sm:$0xff]  ;;  %v2738_v5 = vld [vmem:[%s3208_s8 + $0x68] sm:$0xff] }
 0x10b   :  { %v2752_v52 = vpop.eup %2751  ;;  %v1104_v26 = vadd.f32 %v1103_v7, %v1090_v20  ;;  %1458 = vmatpush.bf16.msrb.mxu3 %v2418_v13  ;;  %v2395_v7 = vld [vmem:[#allocation8 + $0x88] sm:$0xf0]  ;;  %v2467_v13 = vld [vmem:[#allocation7 + $0x18] sm:$0xf0] }
 0x10c   :  { %v1232_v58 = vadd.f32 1.0, %v2752_v52  ;;  %v2410_v52 = vor.u32 %v2714_v39, %v2409_v38  ;;  %v2398_v19 = vor.u32 %v2709_v6, %v2395_v7  ;;  %v1564_v7 = vld [vmem:[%s3207_s7] sm:$0x3] }
 0x10d   :  { %v1118_v45 = vadd.f32 %v1117_v9, %v1104_v26 }
 0x10e   :  { %v1236_v63 = vmul.f32 %v1232_v58, %v1204_v57  ;;  %v2403_v57 = vld [vmem:[#allocation8 + $0x98] sm:$0xf0] }
 0x10f   :  { %v1132_v58 = vadd.f32 %v1131_v16, %v1118_v45  ;;  %1459 = vmatpush.bf16.msrb.mxu3 %v2410_v52  ;;  %v2406_v27 = vor.u32 %v2711_v56, %v2403_v57  ;;  %v2462_v45 = vor.u32 %v2685_v42, %v2459_v43 }
 0x110   :  { %v1246_v3 = vpack.c.bf16 %v1236_v63, %v1234_v62  ;;  %v1091_v28 = vpop.f32.mrf.mxu2  ;;  %v2457_v62 = vld [vmem:[#allocation7] sm:$0xf] }
 0x111   :  { %v1105_v32 = vpop.f32.mrf.mxu3  ;;  %v1092_v46 = vadd.f32 %v1091_v28, %v3123_v15  ;;  %v2686_v15 = vld [vmem:[#allocation7 + $0x4] sm:$0xf0]  ;;  %1488 = vmatpush.bf16.msra.mxu1 %v2406_v27  ;;  %v2728_v27 = vld [vmem:[%s3208_s8 + $0x18] sm:$0xff] }
 0x112   :  { %1448 = vmatmul.bf16.vlgmr.msrb.gmra.mxu2 %v1246_v3  ;;  %1476 = vmatmul.bf16.vlgmr.msra.gmra.mxu0 %v1246_v3  ;;  %v2458_v11 = vor.u32 %v2686_v15, %v2457_v62  ;;  %v2731_v62 = vld [vmem:[%s3208_s8 + $0x30] sm:$0xff] }
 0x113   :  { %v1106_v59 = vadd.f32 %v1105_v32, %v1092_v46  ;;  %1460 = vmatpush.bf16.msrb.mxu3 %v2402_v1  ;;  %v2687_v32 = vld [vmem:[#allocation7 + $0x14] sm:$0xf] }
 0x114   :  { %1543 = vmatpush.bf16.msra.mxu2 %v2458_v11  ;;  %v2470_v39 = vor.u32 %v2687_v32, %v2467_v13  ;;  %v2737_v11 = vld [vmem:[%s3208_s8 + $0x60] sm:$0xff]  ;;  %v1567_v32 = vperm.slane %v1564_v7, 1 }
 0x115   :  { %v1173_v3 = vpop.f32.mrf.mxu1  ;;  %v1120_v8 = vadd.f32 %v1119_v40, %v1106_v59  ;;  %1489 = vmatpush.bf16.msra.mxu1 %v2398_v19  ;;  %v2736_v19 = vld [vmem:[%s3208_s8 + $0x58] sm:$0xff] }
 0x117   :  { %v1187_v12 = vpop.f32.mrf.mxu0  ;;  %v1134_v20 = vadd.f32 %v1133_v48, %v1120_v8  ;;  %1461 = vmatpush.bf16.msrb.mxu3 %v2394_v18  ;;  %v2726_v8 = vld [vmem:[%s3208_s8 + $0x8] sm:$0xff] }
 0x11b   :  { %1554 = vmatpush.bf16.msra.mxu3 %v2486_v21  ;;  %v2734_v21 = vld [vmem:[%s3208_s8 + $0x48] sm:$0xff] }
 0x11d   :  { %v1175_v28 = vpop.f32.mrf.mxu1 }
 0x11f   :  { %v1189_v35 = vpop.f32.mrf.mxu0  ;;  %1555 = vmatpush.bf16.msra.mxu3 %v2478_v31  ;;  %v2733_v31 = vld [vmem:[%s3208_s8 + $0x40] sm:$0xff] }
 0x122   :  { %2487 = vmatmul.msk.bf16.vlgmr.msra.gmra.mxu2 %vm300_vm0, %v3027_v51 }
 0x123   :  { %1556 = vmatpush.bf16.msra.mxu3 %v2470_v39 }
 0x127   :  { %1557 = vmatpush.bf16.msra.mxu3 %v2462_v45 }
 0x128   :  { %v1145_v61 = vpop.f32.mrf.mxu2 }
 0x129   :  { %v1146_v63 = vadd.f32 %v1145_v61, %v1132_v58  ;;  %v1159_v0 = vpop.f32.mrf.mxu3  ;;  %v2732_v61 = vld [vmem:[%s3208_s8 + $0x38] sm:$0xff] }
 0x12a   :  { %1744 = vmatpush.bf16.msrb.mxu0 %v2732_v61 }
 0x12b   :  { %v1160_v9 = vadd.f32 %v1159_v0, %v1146_v63  ;;  %v2730_v63 = vld [vmem:[%s3208_s8 + $0x28] sm:$0xff]  ;;  %v2740_v0 = vld [vmem:[%s3208_s8 + $0x78] sm:$0xff] }
 0x12c   :  { %1758 = vmatpush.bf16.msrb.mxu1 %v2740_v0 }
 0x12d   :  { %v1174_v16 = vadd.f32 %v1173_v3, %v1160_v9  ;;  %v2727_v3 = vld [vmem:[%s3208_s8 + $0x10] sm:$0xff] }
 0x12e   :  { %1745 = vmatpush.bf16.msrb.mxu0 %v2731_v62 }
 0x12f   :  { %v1188_v22 = vadd.f32 %v1187_v12, %v1174_v16  ;;  %v2725_v16 = vld [vmem:[%s3208_s8] sm:$0xff] }
 0x130   :  { %v1147_v23 = vpop.f32.mrf.mxu2  ;;  %1759 = vmatpush.bf16.msrb.mxu1 %v2739_v2 }
 0x131   :  { %v1199_v41 = vadd.f32 %v1195_v14, %v1188_v22  ;;  %v1148_v24 = vadd.f32 %v1147_v23, %v1134_v20  ;;  %v1161_v26 = vpop.f32.mrf.mxu3  ;;  %v2735_v23 = vld [vmem:[%s3208_s8 + $0x50] sm:$0xff] }
 0x132   :  { %1746 = vmatpush.bf16.msrb.mxu0 %v2730_v63 }
 0x133   :  { %v1207_v10 = vmul.f32 %v1199_v41, %v1199_v41  ;;  %v1162_v30 = vadd.f32 %v1161_v26, %v1148_v24  ;;  %v1203_v55 = vmul.f32 0.5, %v1199_v41 }
 0x134   :  { %1760 = vmatpush.bf16.msrb.mxu1 %v2738_v5 }
 0x135   :  { %v1211_v33 = vmul.f32 %v1207_v10, %v1199_v41  ;;  %v1176_v34 = vadd.f32 %v1175_v28, %v1162_v30 }
 0x137   :  { %v1215_v36 = vmul.f32 0.044715, %v1211_v33  ;;  %v1190_v38 = vadd.f32 %v1189_v35, %v1176_v34 }
 0x138   :  { %1761 = vmatpush.bf16.msrb.mxu1 %v2737_v11 }
 0x139   :  { %v1201_v37 = vadd.f32 %v1195_v14, %v1190_v38  ;;  %v1219_v40 = vadd.f32 %v1215_v36, %v1199_v41  ;;  %v1566_v14 = vperm.slane %v1564_v7, 0 }
 0x13b   :  { %v1209_v44 = vmul.f32 %v1201_v37, %v1201_v37  ;;  %v1223_v47 = vmul.f32 0.7978846, %v1219_v40  ;;  %v1205_v56 = vmul.f32 0.5, %v1201_v37 }
 0x13c   :  { %1762 = vmatpush.bf16.msrb.mxu1 %v2736_v19 }
 0x13d   :  { %v1213_v46 = vmul.f32 %v1209_v44, %v1201_v37  ;;  %2753 = vtanh.f32 %v1223_v47 }
 0x13f   :  { %v1217_v48 = vmul.f32 0.044715, %v1213_v46 }
 0x140   :  { %1763 = vmatpush.bf16.msrb.mxu1 %v2735_v23 }
 0x141   :  { %v1221_v49 = vadd.f32 %v1217_v48, %v1201_v37 }
 0x143   :  { %v1225_v50 = vmul.f32 0.7978846, %v1221_v49  ;;  %v2754_v52 = vpop.eup %2753 }
 0x144   :  { %v1231_v53 = vadd.f32 1.0, %v2754_v52  ;;  %1764 = vmatpush.bf16.msrb.mxu1 %v2734_v21 }
 0x145   :  { %2755 = vtanh.f32 %v1225_v50 }
 0x146   :  { %v1235_v58 = vmul.f32 %v1231_v53, %v1203_v55 }
 0x148   :  { %1765 = vmatpush.bf16.msrb.mxu1 %v2733_v31 }
 0x14b   :  { %v2756_v54 = vpop.eup %2755 }
 0x14c   :  { %v1233_v57 = vadd.f32 1.0, %v2756_v54 }
 0x14e   :  { %v1237_v59 = vmul.f32 %v1233_v57, %v1205_v56 }
 0x150   :  { %v1247_v60 = vpack.c.bf16 %v1237_v59, %v1235_v58 }
 0x152   :  { %1462 = vmatmul.bf16.vlgmr.msrb.gmra.mxu3 %v1247_v60  ;;  %1490 = vmatmul.bf16.vlgmr.msra.gmra.mxu1 %v1247_v60 }
 0x162   :  { %2488 = vmatmul.msk.bf16.vlgmr.msra.gmra.mxu3 %vm300_vm0, %v3027_v51  ;;  %v2729_v51 = vld [vmem:[%s3208_s8 + $0x20] sm:$0xff] }
 0x163   :  { %1747 = vmatpush.bf16.msrb.mxu0 %v2729_v51 }
 0x167   :  { %1748 = vmatpush.bf16.msrb.mxu0 %v2728_v27 }
 0x16b   :  { %1749 = vmatpush.bf16.msrb.mxu0 %v2727_v3 }
 0x16f   :  { %1750 = vmatpush.bf16.msrb.mxu0 %v2726_v8 }
 0x173   :  { %1751 = vmatpush.bf16.msrb.mxu0 %v2725_v16  ;;  %v2748_v16 = vld [vmem:[%s3209_s9] ss:$0 sm:$0xff] }
 0x18f   :  { %v1477_v10 = vpop.f32.mrf.mxu0 }
 0x195   :  { %v1449_v15 = vpop.f32.mrf.mxu2 }
 0x197   :  { %v1479_v44 = vpop.f32.mrf.mxu0 }
 0x19d   :  { %v1451_v1 = vpop.f32.mrf.mxu2 }
 0x1a5   :  { %v1545_v6 = vpop.f32.mrf.mxu2 }
 0x1ad   :  { %v1547_v24 = vpop.f32.mrf.mxu2 }
 0x1cf   :  { %v1491_v26 = vpop.f32.mrf.mxu1 }
 0x1d0   :  { %v1492_v33 = vadd.f32 %v1491_v26, %v1477_v10 }
 0x1d5   :  { %v1463_v9 = vpop.f32.mrf.mxu3 }
 0x1d6   :  { %v1464_v12 = vadd.f32 %v1463_v9, %v1449_v15 }
 0x1d7   :  { %v1493_v40 = vpop.f32.mrf.mxu1 }
 0x1d8   :  { %v1546_v18 = vadd.f32 %v1545_v6, %v1464_v12  ;;  %v1494_v45 = vadd.f32 %v1493_v40, %v1479_v44 }
 0x1da   :  { %v1570_v20 = vadd.f32 %v1566_v14, %v1546_v18 }
 0x1dc   :  { %v1578_v22 = vmul.f32 %v1570_v20, %v1570_v20  ;;  %v1574_v60 = vmul.f32 0.5, %v1570_v20 }
 0x1dd   :  { %v1465_v41 = vpop.f32.mrf.mxu3 }
 0x1de   :  { %v1582_v25 = vmul.f32 %v1578_v22, %v1570_v20  ;;  %v1466_v17 = vadd.f32 %v1465_v41, %v1451_v1 }
 0x1e0   :  { %v1586_v4 = vmul.f32 0.044715, %v1582_v25  ;;  %v1548_v29 = vadd.f32 %v1547_v24, %v1466_v17 }
 0x1e2   :  { %v1590_v30 = vadd.f32 %v1586_v4, %v1570_v20  ;;  %v1572_v28 = vadd.f32 %v1566_v14, %v1548_v29 }
 0x1e4   :  { %v1580_v34 = vmul.f32 %v1572_v28, %v1572_v28  ;;  %v1594_v35 = vmul.f32 0.7978846, %v1590_v30  ;;  %v1576_v61 = vmul.f32 0.5, %v1572_v28 }
 0x1e5   :  { %v1559_v13 = vpop.f32.mrf.mxu3 }
 0x1e6   :  { %v1584_v36 = vmul.f32 %v1580_v34, %v1572_v28  ;;  %v1560_v38 = vadd.f32 %v1559_v13, %v1492_v33  ;;  %2757 = vtanh.f32 %v1594_v35 }
 0x1e8   :  { %v1588_v39 = vmul.f32 0.044715, %v1584_v36  ;;  %v1571_v37 = vadd.f32 %v1567_v32, %v1560_v38 }
 0x1ea   :  { %v1592_v42 = vadd.f32 %v1588_v39, %v1572_v28  ;;  %v1579_v43 = vmul.f32 %v1571_v37, %v1571_v37  ;;  %v1575_v6 = vmul.f32 0.5, %v1571_v37 }
 0x1ec   :  { %v1596_v46 = vmul.f32 0.7978846, %v1592_v42  ;;  %v1583_v47 = vmul.f32 %v1579_v43, %v1571_v37  ;;  %v2758_v52 = vpop.eup %2757 }
 0x1ed   :  { %v1561_v48 = vpop.f32.mrf.mxu3  ;;  %v1602_v56 = vadd.f32 1.0, %v2758_v52 }
 0x1ee   :  { %2759 = vtanh.f32 %v1596_v46  ;;  %v1587_v49 = vmul.f32 0.044715, %v1583_v47  ;;  %v1562_v50 = vadd.f32 %v1561_v48, %v1494_v45 }
 0x1ef   :  { %v1606_v63 = vmul.f32 %v1602_v56, %v1574_v60 }
 0x1f0   :  { %v1591_v53 = vadd.f32 %v1587_v49, %v1571_v37  ;;  %v1573_v54 = vadd.f32 %v1567_v32, %v1562_v50 }
 0x1f2   :  { %v1581_v55 = vmul.f32 %v1573_v54, %v1573_v54  ;;  %v1595_v58 = vmul.f32 0.7978846, %v1591_v53  ;;  %v1577_v7 = vmul.f32 0.5, %v1573_v54 }
 0x1f4   :  { %v2760_v57 = vpop.eup %2759  ;;  %v1585_v59 = vmul.f32 %v1581_v55, %v1573_v54  ;;  %2761 = vtanh.f32 %v1595_v58 }
 0x1f5   :  { %v1604_v62 = vadd.f32 1.0, %v2760_v57 }
 0x1f6   :  { %v1589_v15 = vmul.f32 0.044715, %v1585_v59 }
 0x1f7   :  { %v1608_v51 = vmul.f32 %v1604_v62, %v1576_v61 }
 0x1f8   :  { %v1593_v0 = vadd.f32 %v1589_v15, %v1573_v54 }
 0x1f9   :  { %v1610_v1 = vpack.c.bf16 %v1608_v51, %v1606_v63 }
 0x1fa   :  { %v1597_v27 = vmul.f32 0.7978846, %v1593_v0  ;;  %v2762_v2 = vpop.eup %2761 }
 0x1fb   :  { %1752 = vmatmul.bf16.vlgmr.msrb.gmra.mxu0 %v1610_v1  ;;  %v1603_v3 = vadd.f32 1.0, %v2762_v2 }
 0x1fc   :  { %2763 = vtanh.f32 %v1597_v27 }
 0x1fd   :  { %v1607_v9 = vmul.f32 %v1603_v3, %v1575_v6 }
 0x202   :  { %v2764_v5 = vpop.eup %2763 }
 0x203   :  { %v1605_v8 = vadd.f32 1.0, %v2764_v5 }
 0x205   :  { %v1609_v11 = vmul.f32 %v1605_v8, %v1577_v7 }
 0x207   :  { %v1611_v12 = vpack.c.bf16 %v1609_v11, %v1607_v9 }
 0x209   :  { %1766 = vmatmul.bf16.vlgmr.msrb.gmra.mxu1 %v1611_v12 }
 0x278   :  { %v1753_v14 = vpop.f32.mrf.mxu0 }
 0x279   :  { %v1754_v18 = vadd.f32 %v2748_v16, %v1753_v14 }
 0x280   :  { %v1755_v22 = vpop.f32.mrf.mxu0 }
 0x281   :  { %v1756_v23 = vadd.f32 %v2748_v16, %v1755_v22 }
 0x286   :  { %v1767_v19 = vpop.f32.mrf.mxu1 }
 0x287   :  { %v1768_v20 = vadd.f32 %v1767_v19, %v1754_v18 }
 0x289   :  { %1772 = vst.msk [vmem:[#allocation10] sm:$0xff] %vm300_vm0, %v1768_v20 }
 0x28e   :  { %v1769_v41 = vpop.f32.mrf.mxu1 }
 0x28f   :  { %v1770_v24 = vadd.f32 %v1769_v41, %v1756_v23 }
 0x291   :  { %1773 = vst.msk [vmem:[#allocation10 + $0x8] sm:$0xff] %vm300_vm0, %v1770_v24 }
 0x292   :  { %1786 = dma.vmem_to_hbm [thread:$0]  %s1779_s17, 256, %s1781_s20, [#allocation4], %s2894_s21, %s2894_s21, %s2895_s22  }
 0x293   :  { %2891 = dma.done.wait [#allocation4], 256  }
 0x294   :  { %2892 = vsyncadd [#allocation4], 4294967040 }
 0x295   :  { %1791 = vsyncpa [#allocation3], 1 }
 0x296   :  { %1792 = vsyncpa [#allocation6], 1 }
 0x297   :  { %1793 = vsyncpa [#allocation9], 1 }
 0x298   :  { %1794 = vsyncpa [#allocation4], 1 }

</bundles_post_ra>
